<compile_context>
chip_gen: v7x
topology: tpu7x:2x2x1
jax: 0.10.0
libtpu: 0.0.40
codegen_flags: <defaults>
</compile_context>

<pallas_src>
import functools

import jax
import jax.numpy as jnp
from jax.experimental import pallas as pl
from jax.experimental.pallas import tpu as pltpu

LANE = 128

_VMEM_BUDGET = 32 * 1024 * 1024   # per-call working-set target (all generations)
_VMEM_CAP = 48 * 1024 * 1024      # never request more (v7x physical VMEM = 64 MiB)


def _round_up(v, m):
    return (v + m - 1) // m * m


def _vmem_limit(est_bytes):
    # generous headroom over the (already double-buffer-aware) estimate,
    # capped so it stays safe on v7x.
    return int(min(max(est_bytes + (16 << 20), 32 << 20), _VMEM_CAP))


def _pick_row_tile(np_rows, per_row_stream_bytes, resident_bytes):
    """Largest row-block (multiple of 16, divides np_rows) fitting the budget."""
    for t in (512, 256, 128, 64, 32, 16):
        if np_rows % t == 0:
            est = resident_bytes + t * per_row_stream_bytes
            if est <= _VMEM_BUDGET:
                return t, est
    # TODO(synk): column-tile adj (2-D grid) for graphs this large.
    raise ValueError("VGAE encoder row block does not fit the VMEM budget")


# ---------------------------------------------------------------------------
# Kernels (all MXU operands bf16, f32 accumulation).
# ---------------------------------------------------------------------------
def _xw_kernel(x_ref, w_ref, o_ref):
    x = x_ref[...].astype(jnp.bfloat16)
    o_ref[...] = jnp.dot(x, w_ref[...],
                         preferred_element_type=jnp.float32).astype(o_ref.dtype)


def _adj_relu_kernel(adj_ref, s_ref, o_ref):
    a = adj_ref[...].astype(jnp.bfloat16)
    h = jnp.dot(a, s_ref[...], preferred_element_type=jnp.float32)
    o_ref[...] = jnp.maximum(h, 0.0).astype(o_ref.dtype)


def _adj_w_kernel(adj_ref, h_ref, w_ref, o_ref):
    a = adj_ref[...].astype(jnp.bfloat16)
    g = jnp.dot(a, h_ref[...], preferred_element_type=jnp.float32)
    o_ref[...] = jnp.dot(g.astype(jnp.bfloat16), w_ref[...],
                         preferred_element_type=jnp.float32).astype(o_ref.dtype)


def _decoder_kernel(zl_ref, zt_ref, o_ref):
    o_ref[...] = jnp.dot(zl_ref[...], zt_ref[...],
                         preferred_element_type=jnp.float32).astype(o_ref.dtype)


# ---------------------------------------------------------------------------
# Row-tiled pallas_call wrappers.
# ---------------------------------------------------------------------------
def _xw(xp, w1p):
    Np, Fp = xp.shape
    Hp = w1p.shape[1]
    stream = 2 * (Fp * 4 + Hp * 2)          # x row (f32) + s1 row (bf16), 2x buffered
    resident = 2 * Fp * Hp * 2              # W1 (bf16), 2x buffered
    te, est = _pick_row_tile(Np, stream, resident)
    return pl.pallas_call(
        _xw_kernel,
        out_shape=jax.ShapeDtypeStruct((Np, Hp), jnp.bfloat16),
        grid_spec=pltpu.PrefetchScalarGridSpec(
            num_scalar_prefetch=0, grid=(Np // te,),
            in_specs=[pl.BlockSpec((te, Fp), lambda i: (i, 0)),
                      pl.BlockSpec((Fp, Hp), lambda i: (0, 0))],
            out_specs=pl.BlockSpec((te, Hp), lambda i: (i, 0))),
        compiler_params=pltpu.CompilerParams(
            dimension_semantics=("parallel",),
            vmem_limit_bytes=_vmem_limit(est)),
        cost_estimate=pl.CostEstimate(
            flops=2 * Np * Fp * Hp, transcendentals=0,
            bytes_accessed=Np * Fp * 4 + Fp * Hp * 2 + Np * Hp * 2),
    )(xp, w1p)


def _adj_relu(adjp, s1):
    Np = adjp.shape[0]
    Hp = s1.shape[1]
    stream = 2 * (Np * 4 + Hp * 2)          # adj row (f32) + h1 row (bf16)
    resident = 2 * Np * Hp * 2              # s1 (bf16)
    te, est = _pick_row_tile(Np, stream, resident)
    return pl.pallas_call(
        _adj_relu_kernel,
        out_shape=jax.ShapeDtypeStruct((Np, Hp), jnp.bfloat16),
        grid_spec=pltpu.PrefetchScalarGridSpec(
            num_scalar_prefetch=0, grid=(Np // te,),
            in_specs=[pl.BlockSpec((te, Np), lambda i: (i, 0)),
                      pl.BlockSpec((Np, Hp), lambda i: (0, 0))],
            out_specs=pl.BlockSpec((te, Hp), lambda i: (i, 0))),
        compiler_params=pltpu.CompilerParams(
            dimension_semantics=("parallel",),
            vmem_limit_bytes=_vmem_limit(est)),
        cost_estimate=pl.CostEstimate(
            flops=2 * Np * Np * Hp, transcendentals=0,
            bytes_accessed=Np * Np * 4 + Np * Hp * 2 + Np * Hp * 2),
    )(adjp, s1)


def _adj_w(adjp, h1, w23p):
    Np = adjp.shape[0]
    Hp, H2 = w23p.shape                      # H2 == 2 * Hp
    stream = 2 * (Np * 4 + H2 * 4)           # adj row (f32) + out row (f32)
    resident = 2 * (Np * Hp * 2 + Hp * H2 * 2)   # h1 + W23 (bf16)
    te, est = _pick_row_tile(Np, stream, resident)
    return pl.pallas_call(
        _adj_w_kernel,
        out_shape=jax.ShapeDtypeStruct((Np, H2), jnp.float32),
        grid_spec=pltpu.PrefetchScalarGridSpec(
            num_scalar_prefetch=0, grid=(Np // te,),
            in_specs=[pl.BlockSpec((te, Np), lambda i: (i, 0)),
                      pl.BlockSpec((Np, Hp), lambda i: (0, 0)),
                      pl.BlockSpec((Hp, H2), lambda i: (0, 0))],
            out_specs=pl.BlockSpec((te, H2), lambda i: (i, 0))),
        compiler_params=pltpu.CompilerParams(
            dimension_semantics=("parallel",),
            vmem_limit_bytes=_vmem_limit(est)),
        cost_estimate=pl.CostEstimate(
            flops=2 * Np * Np * Hp + 2 * Np * Hp * H2, transcendentals=0,
            bytes_accessed=Np * Np * 4 + Np * Hp * 2 + Hp * H2 * 2 + Np * H2 * 4),
    )(adjp, h1, w23p)


def _decode(z, zt):
    """recon = z @ z.T via a pre-transposed rhs (no per-step transpose)."""
    Np, Hp = z.shape
    tm = 256 if Np % 256 == 0 else 128
    tn = 512 if Np % 512 == 0 else (256 if Np % 256 == 0 else 128)
    est = 2 * (tm * Hp * 2 + Hp * tn * 2 + tm * tn * 4)
    return pl.pallas_call(
        _decoder_kernel,
        out_shape=jax.ShapeDtypeStruct((Np, Np), jnp.float32),
        grid_spec=pltpu.PrefetchScalarGridSpec(
            num_scalar_prefetch=0, grid=(Np // tm, Np // tn),
            in_specs=[pl.BlockSpec((tm, Hp), lambda i, j: (i, 0)),
                      pl.BlockSpec((Hp, tn), lambda i, j: (0, j))],
            out_specs=pl.BlockSpec((tm, tn), lambda i, j: (i, j))),
        compiler_params=pltpu.CompilerParams(
            dimension_semantics=("parallel", "parallel"),
            vmem_limit_bytes=_vmem_limit(est)),
        cost_estimate=pl.CostEstimate(
            flops=2 * Np * Np * Hp, transcendentals=0,
            bytes_accessed=2 * Np * Hp * 2 + Np * Np * 4),
    )(z, zt)


# ---------------------------------------------------------------------------
# VGAE forward (eval mode).
# ---------------------------------------------------------------------------
def vgae_forward(x, adj, w1p, w23p, *, nhid):
    N, F = x.shape
    Fp, Hp = w1p.shape
    H = nhid
    Np = _round_up(N, LANE)

    # Lane-/row-dense zero padding (exact: zero rows of x/adj give zero outputs).
    xp = jnp.pad(x, ((0, Np - N), (0, Fp - F))) if (Np != N or Fp != F) else x
    adjp = jnp.pad(adj, ((0, Np - N), (0, Np - N))) if Np != N else adj

    s1 = _xw(xp, w1p)                 # [Np, Hp]   bf16
    h1 = _adj_relu(adjp, s1)          # [Np, Hp]   bf16
    mulogvar = _adj_w(adjp, h1, w23p)  # [Np, 2Hp]  f32  (mu | logvar, lane-padded)

    mu = mulogvar[:N, :H]
    logvar = mulogvar[:N, Hp:Hp + H]

    # reparameterize: eval mode -> z = mu (padded columns are exactly zero).
    z = mulogvar[:, :Hp].astype(jnp.bfloat16)
    recon = _decode(z, z.T)[:N, :N]
    return recon, mu, logvar


# ---------------------------------------------------------------------------
# Parameter init / one-time preparation (padding + gc2/gc3 fusion, bf16).
# ---------------------------------------------------------------------------
def init_params(key, nfeat, nhid):
    """Deterministic Glorot-uniform init matching GraphConvolution shapes."""
    k1, k2, k3 = jax.random.split(key, 3)

    def glorot(k, fan_in, fan_out):
        limit = jnp.sqrt(6.0 / (fan_in + fan_out))
        return jax.random.uniform(
            k, (fan_in, fan_out), jnp.float32, -limit, limit)

    return {
        "w1": glorot(k1, nfeat, nhid),
        "w2": glorot(k2, nhid, nhid),
        "w3": glorot(k3, nhid, nhid),
    }


def prepare_params(params):
    """Pad to lane multiples, fuse W2|W3, cast to bf16.  Call once per param set."""
    w1, w2, w3 = params["w1"], params["w2"], params["w3"]
    F, H = w1.shape
    Fp = _round_up(F, LANE)
    Hp = _round_up(H, LANE)
    w1p = jnp.pad(w1, ((0, Fp - F), (0, Hp - H))).astype(jnp.bfloat16)
    w2p = jnp.pad(w2, ((0, Hp - H), (0, Hp - H)))
    w3p = jnp.pad(w3, ((0, Hp - H), (0, Hp - H)))
    w23p = jnp.concatenate([w2p, w3p], axis=1).astype(jnp.bfloat16)
    return w1p, w23p


if __name__ == "__main__":
    N, NFEAT, NHID = 256, 64, 32   # small demo shapes

    key = jax.random.PRNGKey(0)
    k_x, k_adj, k_p = jax.random.split(key, 3)

    x = jax.random.normal(k_x, (N, NFEAT), jnp.float32)

    # Symmetric, self-looped, row-normalized dense adjacency.
    a_raw = (jax.random.uniform(k_adj, (N, N)) > 0.9).astype(jnp.float32)
    a_sym = jnp.maximum(a_raw, a_raw.T) + jnp.eye(N, dtype=jnp.float32)
    deg = jnp.sum(a_sym, axis=1, keepdims=True)
    adj = a_sym / deg

    params = init_params(k_p, NFEAT, NHID)
    w1p, w23p = jax.block_until_ready(prepare_params(params))  # one-time prep

    forward = jax.jit(functools.partial(vgae_forward, nhid=NHID))
    recon, mu, logvar = forward(x, adj, w1p, w23p)
    jax.block_until_ready((recon, mu, logvar))

    assert recon.shape == (N, N)
    assert mu.shape == (N, NHID)
    assert logvar.shape == (N, NHID)

    # Pure-JAX f32 reference of the same math (kernel uses bf16 MXU operands
    # with f32 accumulation, so tolerances are loosened accordingly).
    h1_ref = jnp.maximum(adj @ (x @ params["w1"]), 0.0)
    mu_ref = adj @ (h1_ref @ params["w2"])
    logvar_ref = adj @ (h1_ref @ params["w3"])
    recon_ref = mu_ref @ mu_ref.T
    assert jnp.allclose(mu, mu_ref, atol=3e-2, rtol=3e-2)
    assert jnp.allclose(logvar, logvar_ref, atol=3e-2, rtol=3e-2)
    assert jnp.allclose(recon, recon_ref, atol=3e-2, rtol=3e-2)

    print("KERNEL_OK")
</pallas_src>

<mosaic_0001>
module attributes {stable_mosaic.version = 11 : i64} {
  func.func @_adj_relu_kernel(%arg0: i32, %arg1: memref<256x256xf32, #tpu.memory_space<vmem>>, %arg2: memref<256x128xbf16, #tpu.memory_space<vmem>>, %arg3: memref<256x128xbf16, #tpu.memory_space<vmem>>) attributes {dimension_semantics = [#tpu.dimension_semantics<parallel>], iteration_bounds = array<i64: 1>, scalar_prefetch = 0 : i64, scratch_operands = 0 : i64, tpu.core_type = #tpu.core_type<tc>, window_params = [{transform_indices = @transform_0, window_bounds = array<i64: 256, 256>}, {pipeline_mode = #tpu.pipeline_mode<synchronous>, transform_indices = @transform_1, window_bounds = array<i64: 256, 128>}, {transform_indices = @transform_2, window_bounds = array<i64: 256, 128>}]} {
    %c0 = arith.constant 0 : index
    %c0_0 = arith.constant 0 : index
    %0 = vector.load %arg1[%c0, %c0_0] : memref<256x256xf32, #tpu.memory_space<vmem>>, vector<256x256xf32>
    %1 = arith.truncf %0 : vector<256x256xf32> to vector<256x256xbf16>
    %c0_1 = arith.constant 0 : index
    %c0_2 = arith.constant 0 : index
    %2 = vector.load %arg2[%c0_1, %c0_2] : memref<256x128xbf16, #tpu.memory_space<vmem>>, vector<256x128xbf16>
    %cst = arith.constant dense<0.000000e+00> : vector<256x128xf32>
    %3 = tpu.matmul %1, %2, %cst {dimension_numbers = #tpu.dot_dimension_numbers<[1], [0], [0], [1], [0, 0, 1, 1], [], []>} : vector<256x256xbf16>, vector<256x128xbf16>, vector<256x128xf32> -> vector<256x128xf32>
    %cst_3 = arith.constant 0.000000e+00 : f32
    %4 = vector.broadcast %cst_3 : f32 to vector<256x128xf32>
    %5 = arith.maximumf %3, %4 : vector<256x128xf32>
    %6 = arith.truncf %5 : vector<256x128xf32> to vector<256x128xbf16>
    %c0_4 = arith.constant 0 : index
    %c0_5 = arith.constant 0 : index
    %7 = vector.load %arg3[%c0_4, %c0_5] : memref<256x128xbf16, #tpu.memory_space<vmem>>, vector<256x128xbf16>
    tpu.vector_store %arg3[%c0_4, %c0_5], %6 {strides = array<i32>} : memref<256x128xbf16, #tpu.memory_space<vmem>>, vector<256x128xbf16>,
    return
  }
  func.func @transform_0(%arg0: i32) -> (i32, i32) {
    %c0_i32 = arith.constant 0 : i32
    %c0_i32_0 = arith.constant 0 : i32
    return %arg0, %c0_i32 : i32, i32
  }
  func.func @transform_1(%arg0: i32) -> (i32, i32) {
    %c0_i32 = arith.constant 0 : i32
    %c0_i32_0 = arith.constant 0 : i32
    %c0_i32_1 = arith.constant 0 : i32
    return %c0_i32, %c0_i32_0 : i32, i32
  }
  func.func @transform_2(%arg0: i32) -> (i32, i32) {
    %c0_i32 = arith.constant 0 : i32
    %c0_i32_0 = arith.constant 0 : i32
    return %arg0, %c0_i32 : i32, i32
  }
}

module attributes {stable_mosaic.version = 11 : i64} {
  func.func @_xw_kernel(%arg0: i32, %arg1: memref<256x128xf32, #tpu.memory_space<vmem>>, %arg2: memref<128x128xbf16, #tpu.memory_space<vmem>>, %arg3: memref<256x128xbf16, #tpu.memory_space<vmem>>) attributes {dimension_semantics = [#tpu.dimension_semantics<parallel>], iteration_bounds = array<i64: 1>, scalar_prefetch = 0 : i64, scratch_operands = 0 : i64, tpu.core_type = #tpu.core_type<tc>, window_params = [{transform_indices = @transform_0, window_bounds = array<i64: 256, 128>}, {pipeline_mode = #tpu.pipeline_mode<synchronous>, transform_indices = @transform_1, window_bounds = array<i64: 128, 128>}, {transform_indices = @transform_2, window_bounds = array<i64: 256, 128>}]} {
    %c0 = arith.constant 0 : index
    %c0_0 = arith.constant 0 : index
    %0 = vector.load %arg1[%c0, %c0_0] : memref<256x128xf32, #tpu.memory_space<vmem>>, vector<256x128xf32>
    %1 = arith.truncf %0 : vector<256x128xf32> to vector<256x128xbf16>
    %c0_1 = arith.constant 0 : index
    %c0_2 = arith.constant 0 : index
    %2 = vector.load %arg2[%c0_1, %c0_2] : memref<128x128xbf16, #tpu.memory_space<vmem>>, vector<128x128xbf16>
    %cst = arith.constant dense<0.000000e+00> : vector<256x128xf32>
    %3 = tpu.matmul %1, %2, %cst {dimension_numbers = #tpu.dot_dimension_numbers<[1], [0], [0], [1], [0, 0, 1, 1], [], []>} : vector<256x128xbf16>, vector<128x128xbf16>, vector<256x128xf32> -> vector<256x128xf32>
    %4 = arith.truncf %3 : vector<256x128xf32> to vector<256x128xbf16>
    %c0_3 = arith.constant 0 : index
    %c0_4 = arith.constant 0 : index
    %5 = vector.load %arg3[%c0_3, %c0_4] : memref<256x128xbf16, #tpu.memory_space<vmem>>, vector<256x128xbf16>
    tpu.vector_store %arg3[%c0_3, %c0_4], %4 {strides = array<i32>} : memref<256x128xbf16, #tpu.memory_space<vmem>>, vector<256x128xbf16>,
    return
  }
  func.func @transform_0(%arg0: i32) -> (i32, i32) {
    %c0_i32 = arith.constant 0 : i32
    %c0_i32_0 = arith.constant 0 : i32
    return %arg0, %c0_i32 : i32, i32
  }
  func.func @transform_1(%arg0: i32) -> (i32, i32) {
    %c0_i32 = arith.constant 0 : i32
    %c0_i32_0 = arith.constant 0 : i32
    %c0_i32_1 = arith.constant 0 : i32
    return %c0_i32, %c0_i32_0 : i32, i32
  }
  func.func @transform_2(%arg0: i32) -> (i32, i32) {
    %c0_i32 = arith.constant 0 : i32
    %c0_i32_0 = arith.constant 0 : i32
    return %arg0, %c0_i32 : i32, i32
  }
}

module attributes {stable_mosaic.version = 11 : i64} {
  func.func @_adj_w_kernel(%arg0: i32, %arg1: memref<256x256xf32, #tpu.memory_space<vmem>>, %arg2: memref<256x128xbf16, #tpu.memory_space<vmem>>, %arg3: memref<128x256xbf16, #tpu.memory_space<vmem>>, %arg4: memref<256x256xf32, #tpu.memory_space<vmem>>) attributes {dimension_semantics = [#tpu.dimension_semantics<parallel>], iteration_bounds = array<i64: 1>, scalar_prefetch = 0 : i64, scratch_operands = 0 : i64, tpu.core_type = #tpu.core_type<tc>, window_params = [{transform_indices = @transform_0, window_bounds = array<i64: 256, 256>}, {pipeline_mode = #tpu.pipeline_mode<synchronous>, transform_indices = @transform_1, window_bounds = array<i64: 256, 128>}, {pipeline_mode = #tpu.pipeline_mode<synchronous>, transform_indices = @transform_2, window_bounds = array<i64: 128, 256>}, {transform_indices = @transform_3, window_bounds = array<i64: 256, 256>}]} {
    %c0 = arith.constant 0 : index
    %c0_0 = arith.constant 0 : index
    %0 = vector.load %arg1[%c0, %c0_0] : memref<256x256xf32, #tpu.memory_space<vmem>>, vector<256x256xf32>
    %1 = arith.truncf %0 : vector<256x256xf32> to vector<256x256xbf16>
    %c0_1 = arith.constant 0 : index
    %c0_2 = arith.constant 0 : index
    %2 = vector.load %arg2[%c0_1, %c0_2] : memref<256x128xbf16, #tpu.memory_space<vmem>>, vector<256x128xbf16>
    %cst = arith.constant dense<0.000000e+00> : vector<256x128xf32>
    %3 = tpu.matmul %1, %2, %cst {dimension_numbers = #tpu.dot_dimension_numbers<[1], [0], [0], [1], [0, 0, 1, 1], [], []>} : vector<256x256xbf16>, vector<256x128xbf16>, vector<256x128xf32> -> vector<256x128xf32>
    %4 = arith.truncf %3 : vector<256x128xf32> to vector<256x128xbf16>
    %c0_3 = arith.constant 0 : index
    %c0_4 = arith.constant 0 : index
    %5 = vector.load %arg3[%c0_3, %c0_4] : memref<128x256xbf16, #tpu.memory_space<vmem>>, vector<128x256xbf16>
    %cst_5 = arith.constant dense<0.000000e+00> : vector<256x256xf32>
    %6 = tpu.matmul %4, %5, %cst_5 {dimension_numbers = #tpu.dot_dimension_numbers<[1], [0], [0], [1], [0, 0, 1, 1], [], []>} : vector<256x128xbf16>, vector<128x256xbf16>, vector<256x256xf32> -> vector<256x256xf32>
    %c0_6 = arith.constant 0 : index
    %c0_7 = arith.constant 0 : index
    %7 = vector.load %arg4[%c0_6, %c0_7] : memref<256x256xf32, #tpu.memory_space<vmem>>, vector<256x256xf32>
    tpu.vector_store %arg4[%c0_6, %c0_7], %6 {strides = array<i32>} : memref<256x256xf32, #tpu.memory_space<vmem>>, vector<256x256xf32>,
    return
  }
  func.func @transform_0(%arg0: i32) -> (i32, i32) {
    %c0_i32 = arith.constant 0 : i32
    %c0_i32_0 = arith.constant 0 : i32
    return %arg0, %c0_i32 : i32, i32
  }
  func.func @transform_1(%arg0: i32) -> (i32, i32) {
    %c0_i32 = arith.constant 0 : i32
    %c0_i32_0 = arith.constant 0 : i32
    %c0_i32_1 = arith.constant 0 : i32
    return %c0_i32, %c0_i32_0 : i32, i32
  }
  func.func @transform_2(%arg0: i32) -> (i32, i32) {
    %c0_i32 = arith.constant 0 : i32
    %c0_i32_0 = arith.constant 0 : i32
    %c0_i32_1 = arith.constant 0 : i32
    return %c0_i32, %c0_i32_0 : i32, i32
  }
  func.func @transform_3(%arg0: i32) -> (i32, i32) {
    %c0_i32 = arith.constant 0 : i32
    %c0_i32_0 = arith.constant 0 : i32
    return %arg0, %c0_i32 : i32, i32
  }
}

module attributes {stable_mosaic.version = 11 : i64} {
  func.func @_decoder_kernel(%arg0: i32, %arg1: i32, %arg2: memref<256x128xbf16, #tpu.memory_space<vmem>>, %arg3: memref<128x256xbf16, #tpu.memory_space<vmem>>, %arg4: memref<256x256xf32, #tpu.memory_space<vmem>>) attributes {dimension_semantics = [#tpu.dimension_semantics<parallel>, #tpu.dimension_semantics<parallel>], iteration_bounds = array<i64: 1, 1>, scalar_prefetch = 0 : i64, scratch_operands = 0 : i64, tpu.core_type = #tpu.core_type<tc>, window_params = [{transform_indices = @transform_0, window_bounds = array<i64: 256, 128>}, {transform_indices = @transform_1, window_bounds = array<i64: 128, 256>}, {transform_indices = @transform_2, window_bounds = array<i64: 256, 256>}]} {
    %c0 = arith.constant 0 : index
    %c0_0 = arith.constant 0 : index
    %0 = vector.load %arg2[%c0, %c0_0] : memref<256x128xbf16, #tpu.memory_space<vmem>>, vector<256x128xbf16>
    %c0_1 = arith.constant 0 : index
    %c0_2 = arith.constant 0 : index
    %1 = vector.load %arg3[%c0_1, %c0_2] : memref<128x256xbf16, #tpu.memory_space<vmem>>, vector<128x256xbf16>
    %cst = arith.constant dense<0.000000e+00> : vector<256x256xf32>
    %2 = tpu.matmul %0, %1, %cst {dimension_numbers = #tpu.dot_dimension_numbers<[1], [0], [0], [1], [0, 0, 1, 1], [], []>} : vector<256x128xbf16>, vector<128x256xbf16>, vector<256x256xf32> -> vector<256x256xf32>
    %c0_3 = arith.constant 0 : index
    %c0_4 = arith.constant 0 : index
    %3 = vector.load %arg4[%c0_3, %c0_4] : memref<256x256xf32, #tpu.memory_space<vmem>>, vector<256x256xf32>
    tpu.vector_store %arg4[%c0_3, %c0_4], %2 {strides = array<i32>} : memref<256x256xf32, #tpu.memory_space<vmem>>, vector<256x256xf32>,
    return
  }
  func.func @transform_0(%arg0: i32, %arg1: i32) -> (i32, i32) {
    %c0_i32 = arith.constant 0 : i32
    %c0_i32_0 = arith.constant 0 : i32
    return %arg0, %c0_i32 : i32, i32
  }
  func.func @transform_1(%arg0: i32, %arg1: i32) -> (i32, i32) {
    %c0_i32 = arith.constant 0 : i32
    %c0_i32_0 = arith.constant 0 : i32
    return %c0_i32, %arg1 : i32, i32
  }
  func.func @transform_2(%arg0: i32, %arg1: i32) -> (i32, i32) {
    %c0_i32 = arith.constant 0 : i32
    return %arg0, %arg1 : i32, i32
  }
}

</mosaic_0001>

<bundles_post_ra>
// kernel: vgae_forward.4
= control target key start
LH: loop header
LB: loop body
LE: loop exit
PB: predicated region body
PF: predicated region fallthrough
CT: control target
= control target key end

     0   :  { %s895_s1 = inlined_call_operand.vmem [shape: bf16[128,128], index: 1, kind: input, shape index: {}]   ;;  %s896_s0 = inlined_call_operand.vmem [shape: f32[256,128], index: 0, kind: input, shape index: {}]   ;;  %s897_s2 = inlined_call_operand.vmem [shape: bf16[256,128], index: 2, kind: output, shape index: {}]  }
   0x1   :  { %v704_v0 = vld [vmem:[%s895_s1] sm:$0xff]   ;;  %v705_v1 = vld [vmem:[%s895_s1 + $0x8] sm:$0xff]   ;;  %v706_v2 = vld [vmem:[%s895_s1 + $0x10] sm:$0xff]  }
   0x2   :  { %640 = vmatprep.subr.bf16.mxu0 %v704_v0  ;;  %688 = vmatprep.subr.bf16.mxu1 %v704_v0  ;;  %v707_v3 = vld [vmem:[%s895_s1 + $0x18] sm:$0xff]   ;;  %v12_v4 = vld [vmem:[%s896_s0] sm:$0xff]  ;;  %v13_v5 = vld [vmem:[%s896_s0 + $0x8] sm:$0xff] }
   0x3   :  { %641 = vmatpush3.bf16.msra.mxu0 %v704_v0  ;;  %696 = vmatpush3.bf16.msra.mxu1 %v704_v0  ;;  %v28_v6 = vld [vmem:[%s896_s0 + $0x80] sm:$0xff]  ;;  %v44_v7 = vpack.c.bf16 %v13_v5, %v12_v4  ;;  %v29_v8 = vld [vmem:[%s896_s0 + $0x88] sm:$0xff]  ;;  %v710_v12 = vld [vmem:[%s895_s1 + $0x30] sm:$0xff]  }
   0x4   :  { %642 = vmatprep.subr.bf16.mxu0 %v705_v1  ;;  %689 = vmatprep.subr.bf16.mxu1 %v705_v1  ;;  %v52_v9 = vpack.c.bf16 %v29_v8, %v28_v6  ;;  %v708_v10 = vld [vmem:[%s895_s1 + $0x20] sm:$0xff]   ;;  %v709_v11 = vld [vmem:[%s895_s1 + $0x28] sm:$0xff]   ;;  %v711_v13 = vld [vmem:[%s895_s1 + $0x38] sm:$0xff]  }
   0x5   :  { %656 = vmatprep.mubr.bf16.mxu0 %v44_v7  ;;  %v14_v14 = vld [vmem:[%s896_s0 + $0x10] sm:$0xff]  ;;  %v15_v15 = vld [vmem:[%s896_s0 + $0x18] sm:$0xff]  ;;  %v16_v18 = vld [vmem:[%s896_s0 + $0x20] sm:$0xff] }
   0x6   :  { %672 = vmatprep.mubr.bf16.mxu1 %v52_v9  ;;  %v30_v16 = vld [vmem:[%s896_s0 + $0x90] sm:$0xff]  ;;  %v31_v17 = vld [vmem:[%s896_s0 + $0x98] sm:$0xff]  ;;  %v17_v19 = vld [vmem:[%s896_s0 + $0x28] sm:$0xff]  ;;  %v45_v22 = vpack.c.bf16 %v15_v15, %v14_v14 }
   0x7   :  { %643 = vmatpush3.bf16.msra.mxu0 %v705_v1  ;;  %697 = vmatpush3.bf16.msra.mxu1 %v705_v1  ;;  %v32_v20 = vld [vmem:[%s896_s0 + $0xa0] sm:$0xff]  ;;  %v33_v21 = vld [vmem:[%s896_s0 + $0xa8] sm:$0xff]  ;;  %v53_v23 = vpack.c.bf16 %v31_v17, %v30_v16  ;;  %v46_v24 = vpack.c.bf16 %v17_v19, %v16_v18  ;;  %v18_v26 = vld [vmem:[%s896_s0 + $0x30] sm:$0xff] }
   0x8   :  { %644 = vmatprep.subr.bf16.mxu0 %v706_v2  ;;  %690 = vmatprep.subr.bf16.mxu1 %v706_v2  ;;  %v54_v25 = vpack.c.bf16 %v33_v21, %v32_v20  ;;  %v19_v27 = vld [vmem:[%s896_s0 + $0x38] sm:$0xff]  ;;  %v34_v28 = vld [vmem:[%s896_s0 + $0xb0] sm:$0xff]  ;;  %v20_v30 = vld [vmem:[%s896_s0 + $0x40] sm:$0xff] }
   0x9   :  { %v35_v29 = vld [vmem:[%s896_s0 + $0xb8] sm:$0xff]  ;;  %v21_v31 = vld [vmem:[%s896_s0 + $0x48] sm:$0xff]  ;;  %v36_v32 = vld [vmem:[%s896_s0 + $0xc0] sm:$0xff]  ;;  %v47_v34 = vpack.c.bf16 %v19_v27, %v18_v26 }
   0xa   :  { %v37_v33 = vld [vmem:[%s896_s0 + $0xc8] sm:$0xff]  ;;  %v55_v35 = vpack.c.bf16 %v35_v29, %v34_v28  ;;  %v48_v36 = vpack.c.bf16 %v21_v31, %v20_v30  ;;  %v22_v38 = vld [vmem:[%s896_s0 + $0x50] sm:$0xff]  ;;  %v23_v39 = vld [vmem:[%s896_s0 + $0x58] sm:$0xff] }
   0xb   :  { %645 = vmatpush3.bf16.msra.mxu0 %v706_v2  ;;  %698 = vmatpush3.bf16.msra.mxu1 %v706_v2  ;;  %v56_v37 = vpack.c.bf16 %v37_v33, %v36_v32  ;;  %v38_v40 = vld [vmem:[%s896_s0 + $0xd0] sm:$0xff]  ;;  %v39_v41 = vld [vmem:[%s896_s0 + $0xd8] sm:$0xff]  ;;  %v24_v42 = vld [vmem:[%s896_s0 + $0x60] sm:$0xff]  ;;  %v49_v46 = vpack.c.bf16 %v23_v39, %v22_v38 }
   0xc   :  { %646 = vmatprep.subr.bf16.mxu0 %v707_v3  ;;  %691 = vmatprep.subr.bf16.mxu1 %v707_v3  ;;  %v25_v43 = vld [vmem:[%s896_s0 + $0x68] sm:$0xff]  ;;  %v40_v44 = vld [vmem:[%s896_s0 + $0xe0] sm:$0xff]  ;;  %v57_v47 = vpack.c.bf16 %v39_v41, %v38_v40  ;;  %v26_v50 = vld [vmem:[%s896_s0 + $0x70] sm:$0xff] }
   0xd   :  { %v41_v45 = vld [vmem:[%s896_s0 + $0xe8] sm:$0xff]  ;;  %v50_v48 = vpack.c.bf16 %v25_v43, %v24_v42  ;;  %v27_v51 = vld [vmem:[%s896_s0 + $0x78] sm:$0xff]  ;;  %v42_v52 = vld [vmem:[%s896_s0 + $0xf0] sm:$0xff] }
   0xe   :  { %v58_v49 = vpack.c.bf16 %v41_v45, %v40_v44  ;;  %v43_v53 = vld [vmem:[%s896_s0 + $0xf8] sm:$0xff]  ;;  %v51_v54 = vpack.c.bf16 %v27_v51, %v26_v50 }
   0xf   :  { %647 = vmatpush3.bf16.msra.mxu0 %v707_v3  ;;  %699 = vmatpush3.bf16.msra.mxu1 %v707_v3  ;;  %v59_v55 = vpack.c.bf16 %v43_v53, %v42_v52 }
  0x10   :  { %648 = vmatprep.subr.bf16.mxu0 %v708_v10  ;;  %692 = vmatprep.subr.bf16.mxu1 %v708_v10 }
  0x13   :  { %649 = vmatpush3.bf16.msra.mxu0 %v708_v10  ;;  %700 = vmatpush3.bf16.msra.mxu1 %v708_v10 }
  0x14   :  { %650 = vmatprep.subr.bf16.mxu0 %v709_v11  ;;  %693 = vmatprep.subr.bf16.mxu1 %v709_v11 }
  0x17   :  { %651 = vmatpush3.bf16.msra.mxu0 %v709_v11  ;;  %701 = vmatpush3.bf16.msra.mxu1 %v709_v11 }
  0x18   :  { %652 = vmatprep.subr.bf16.mxu0 %v710_v12  ;;  %694 = vmatprep.subr.bf16.mxu1 %v710_v12 }
  0x1b   :  { %653 = vmatpush3.bf16.msra.mxu0 %v710_v12  ;;  %702 = vmatpush3.bf16.msra.mxu1 %v710_v12 }
  0x1c   :  { %654 = vmatprep.subr.bf16.mxu0 %v711_v13  ;;  %695 = vmatprep.subr.bf16.mxu1 %v711_v13 }
  0x1f   :  { %655 = vmatpush3.bf16.msra.mxu0 %v711_v13  ;;  %703 = vmatpush3.bf16.msra.mxu1 %v711_v13 }
  0x22   :  { %657 = vmatmul.mubr.bf16.vlgmr.msra.gmra.mrb[0].mxu0 %v45_v22  ;;  %673 = vmatmul.mubr.bf16.vlgmr.msra.gmra.mrb[0].mxu1 %v53_v23 }
  0x23   :  { %660 = vmatprep.mubr.bf16.mxu0 %v46_v24  ;;  %676 = vmatprep.mubr.bf16.mxu1 %v54_v25 }
  0x2a   :  { %661 = vmatmul.mubr.bf16.gmra.mrb[4].mxu0 %v47_v34  ;;  %677 = vmatmul.mubr.bf16.gmra.mrb[4].mxu1 %v55_v35 }
  0x2b   :  { %664 = vmatprep.mubr.bf16.mxu0 %v48_v36  ;;  %680 = vmatprep.mubr.bf16.mxu1 %v56_v37 }
  0x32   :  { %665 = vmatmul.mubr.bf16.gmra.mrb[8].mxu0 %v49_v46  ;;  %681 = vmatmul.mubr.bf16.gmra.mrb[8].mxu1 %v57_v47 }
  0x33   :  { %668 = vmatprep.mubr.bf16.mxu0 %v50_v48  ;;  %684 = vmatprep.mubr.bf16.mxu1 %v58_v49 }
  0x3a   :  { %669 = vmatmul.mubr.bf16.gmra.mrb[12].mxu0 %v51_v54  ;;  %685 = vmatmul.mubr.bf16.gmra.mrb[12].mxu1 %v59_v55 }
  0xf5   :  { %v658_v56 = vpop.f32.mrb[0].mxu0  ;;  %v674_v57 = vpop.f32.mrb[0].mxu1 }
  0xf6   :  { %v158_v58 = vpop.f32.mrb[1].mxu0  ;;  %v222_v59 = vpop.f32.mrb[1].mxu1 }
  0xf7   :  { %v659_v60 = vpop.f32.mrb[2].mxu0  ;;  %v675_v61 = vpop.f32.mrb[2].mxu1 }
  0xf8   :  { %v529_v62 = vpack.c.bf16 %v659_v60, %v658_v56  ;;  %v569_v63 = vpack.c.bf16 %v675_v61, %v674_v57  ;;  %v161_v0 = vpop.f32.mrb[3].mxu0  ;;  %v225_v1 = vpop.f32.mrb[3].mxu1 }
  0xf9   :  { %v524_v2 = vpack.c.bf16 %v161_v0, %v158_v58  ;;  %v564_v3 = vpack.c.bf16 %v225_v1, %v222_v59 }
  0xfa   :  { %601 = vst [vmem:[%s897_s2 + $0x8] sm:$0xff] %v529_v62   ;;  %609 = vst [vmem:[%s897_s2 + $0x48] sm:$0xff] %v569_v63  }
  0xfb   :  { %525 = vst [vmem:[%s897_s2] sm:$0xff] %v524_v2   ;;  %608 = vst [vmem:[%s897_s2 + $0x40] sm:$0xff] %v564_v3  }
  0xfd   :  { %v662_v4 = vpop.f32.mrb[4].mxu0  ;;  %v678_v5 = vpop.f32.mrb[4].mxu1 }
  0xfe   :  { %v174_v6 = vpop.f32.mrb[5].mxu0  ;;  %v238_v7 = vpop.f32.mrb[5].mxu1 }
  0xff   :  { %v663_v8 = vpop.f32.mrb[6].mxu0  ;;  %v679_v9 = vpop.f32.mrb[6].mxu1 }
 0x100   :  { %v539_v10 = vpack.c.bf16 %v663_v8, %v662_v4  ;;  %v579_v11 = vpack.c.bf16 %v679_v9, %v678_v5  ;;  %v177_v12 = vpop.f32.mrb[7].mxu0  ;;  %v241_v13 = vpop.f32.mrb[7].mxu1 }
 0x101   :  { %v534_v14 = vpack.c.bf16 %v177_v12, %v174_v6  ;;  %v574_v15 = vpack.c.bf16 %v241_v13, %v238_v7 }
 0x102   :  { %603 = vst [vmem:[%s897_s2 + $0x18] sm:$0xff] %v539_v10   ;;  %611 = vst [vmem:[%s897_s2 + $0x58] sm:$0xff] %v579_v11  }
 0x103   :  { %602 = vst [vmem:[%s897_s2 + $0x10] sm:$0xff] %v534_v14   ;;  %610 = vst [vmem:[%s897_s2 + $0x50] sm:$0xff] %v574_v15  }
 0x105   :  { %v666_v16 = vpop.f32.mrb[8].mxu0  ;;  %v682_v17 = vpop.f32.mrb[8].mxu1 }
 0x106   :  { %v190_v18 = vpop.f32.mrb[9].mxu0  ;;  %v254_v19 = vpop.f32.mrb[9].mxu1 }
 0x107   :  { %v667_v20 = vpop.f32.mrb[10].mxu0  ;;  %v683_v21 = vpop.f32.mrb[10].mxu1 }
 0x108   :  { %v549_v22 = vpack.c.bf16 %v667_v20, %v666_v16  ;;  %v589_v23 = vpack.c.bf16 %v683_v21, %v682_v17  ;;  %v193_v24 = vpop.f32.mrb[11].mxu0  ;;  %v257_v25 = vpop.f32.mrb[11].mxu1 }
 0x109   :  { %v544_v26 = vpack.c.bf16 %v193_v24, %v190_v18  ;;  %v584_v27 = vpack.c.bf16 %v257_v25, %v254_v19 }
 0x10a   :  { %605 = vst [vmem:[%s897_s2 + $0x28] sm:$0xff] %v549_v22   ;;  %613 = vst [vmem:[%s897_s2 + $0x68] sm:$0xff] %v589_v23  }
 0x10b   :  { %604 = vst [vmem:[%s897_s2 + $0x20] sm:$0xff] %v544_v26   ;;  %612 = vst [vmem:[%s897_s2 + $0x60] sm:$0xff] %v584_v27  }
 0x10d   :  { %v670_v28 = vpop.f32.mrb[12].mxu0  ;;  %v686_v29 = vpop.f32.mrb[12].mxu1 }
 0x10e   :  { %v206_v30 = vpop.f32.mrb[13].mxu0  ;;  %v270_v31 = vpop.f32.mrb[13].mxu1 }
 0x10f   :  { %v671_v32 = vpop.f32.mrb[14].mxu0  ;;  %v687_v33 = vpop.f32.mrb[14].mxu1 }
 0x110   :  { %v559_v34 = vpack.c.bf16 %v671_v32, %v670_v28  ;;  %v599_v35 = vpack.c.bf16 %v687_v33, %v686_v29  ;;  %v209_v36 = vpop.f32.mrb[15].mxu0  ;;  %v273_v37 = vpop.f32.mrb[15].mxu1 }
 0x111   :  { %v554_v38 = vpack.c.bf16 %v209_v36, %v206_v30  ;;  %v594_v39 = vpack.c.bf16 %v273_v37, %v270_v31 }
 0x112   :  { %607 = vst [vmem:[%s897_s2 + $0x38] sm:$0xff] %v559_v34   ;;  %615 = vst [vmem:[%s897_s2 + $0x78] sm:$0xff] %v599_v35  }
 0x113   :  { %606 = vst [vmem:[%s897_s2 + $0x30] sm:$0xff] %v554_v38   ;;  %614 = vst [vmem:[%s897_s2 + $0x70] sm:$0xff] %v594_v39  }

// kernel: vgae_forward.5
= control target key start
LH: loop header
LB: loop body
LE: loop exit
PB: predicated region body
PF: predicated region fallthrough
CT: control target
= control target key end

     0   :  { %s1215_s1 = inlined_call_operand.vmem [shape: bf16[256,128], index: 1, kind: input, shape index: {}]   ;;  %s1216_s0 = inlined_call_operand.vmem [shape: f32[256,256], index: 0, kind: input, shape index: {}]   ;;  %s1217_s2 = inlined_call_operand.vmem [shape: bf16[256,128], index: 2, kind: output, shape index: {}]  }
   0x1   :  { %v896_v0 = vld [vmem:[%s1215_s1 + $0x40] sm:$0xff]   ;;  %v898_v2 = vld [vmem:[%s1215_s1 + $0x48] sm:$0xff]   ;;  %v900_v4 = vld [vmem:[%s1215_s1 + $0x50] sm:$0xff]  }
   0x2   :  { %v897_v1 = vld [vmem:[%s1215_s1] sm:$0xff]   ;;  %768 = vmatprep.subr.bf16.mxu0 %v896_v0  ;;  %880 = vmatprep.subr.bf16.mxu1 %v896_v0  ;;  %v899_v3 = vld [vmem:[%s1215_s1 + $0x8] sm:$0xff]   ;;  %v901_v5 = vld [vmem:[%s1215_s1 + $0x10] sm:$0xff]  }
   0x3   :  { %769 = vmatpush3.bf16.msra.mxu0 %v897_v1  ;;  %888 = vmatpush3.bf16.msra.mxu1 %v897_v1  ;;  %v902_v6 = vld [vmem:[%s1215_s1 + $0x58] sm:$0xff]   ;;  %v904_v8 = vld [vmem:[%s1215_s1 + $0x60] sm:$0xff]   ;;  %v906_v10 = vld [vmem:[%s1215_s1 + $0x68] sm:$0xff]  }
   0x4   :  { %770 = vmatprep.subr.bf16.mxu0 %v898_v2  ;;  %881 = vmatprep.subr.bf16.mxu1 %v898_v2  ;;  %v903_v7 = vld [vmem:[%s1215_s1 + $0x18] sm:$0xff]   ;;  %v905_v9 = vld [vmem:[%s1215_s1 + $0x20] sm:$0xff]   ;;  %v13_v11 = vld [vmem:[%s1216_s0 + $0x8] sm:$0xff] }
   0x5   :  { %v15_v12 = vld [vmem:[%s1216_s0 + $0x18] sm:$0xff]  ;;  %v45_v13 = vld [vmem:[%s1216_s0 + $0x108] sm:$0xff]  ;;  %v908_v18 = vld [vmem:[%s1215_s1 + $0x70] sm:$0xff]  }
   0x6   :  { %v77_v14 = vpack.c.bf16 %v15_v12, %v13_v11  ;;  %v47_v15 = vld [vmem:[%s1216_s0 + $0x118] sm:$0xff]  ;;  %v907_v17 = vld [vmem:[%s1215_s1 + $0x28] sm:$0xff]   ;;  %v909_v19 = vld [vmem:[%s1215_s1 + $0x30] sm:$0xff]  }
   0x7   :  { %771 = vmatpush3.bf16.msra.mxu0 %v899_v3  ;;  %889 = vmatpush3.bf16.msra.mxu1 %v899_v3  ;;  %v93_v16 = vpack.c.bf16 %v47_v15, %v45_v13  ;;  %v910_v20 = vld [vmem:[%s1215_s1 + $0x78] sm:$0xff]   ;;  %v12_v22 = vld [vmem:[%s1216_s0] sm:$0xff]  ;;  %v14_v23 = vld [vmem:[%s1216_s0 + $0x10] sm:$0xff] }
   0x8   :  { %772 = vmatprep.subr.bf16.mxu0 %v900_v4  ;;  %882 = vmatprep.subr.bf16.mxu1 %v900_v4  ;;  %v911_v21 = vld [vmem:[%s1215_s1 + $0x38] sm:$0xff]   ;;  %v44_v24 = vld [vmem:[%s1216_s0 + $0x100] sm:$0xff]  ;;  %v46_v25 = vld [vmem:[%s1216_s0 + $0x110] sm:$0xff]  ;;  %v76_v30 = vpack.c.bf16 %v14_v23, %v12_v22 }
   0x9   :  { %268 = vmatprep.mubr.bf16.mxu0 %v77_v14  ;;  %332 = vmatprep.mubr.bf16.mxu1 %v93_v16  ;;  %v17_v26 = vld [vmem:[%s1216_s0 + $0x28] sm:$0xff]  ;;  %v19_v27 = vld [vmem:[%s1216_s0 + $0x38] sm:$0xff]  ;;  %v92_v31 = vpack.c.bf16 %v46_v25, %v44_v24  ;;  %v16_v34 = vld [vmem:[%s1216_s0 + $0x20] sm:$0xff] }
   0xa   :  { %v49_v28 = vld [vmem:[%s1216_s0 + $0x128] sm:$0xff]  ;;  %v51_v29 = vld [vmem:[%s1216_s0 + $0x138] sm:$0xff]  ;;  %v79_v32 = vpack.c.bf16 %v19_v27, %v17_v26  ;;  %v18_v35 = vld [vmem:[%s1216_s0 + $0x30] sm:$0xff] }
   0xb   :  { %773 = vmatpush3.bf16.msra.mxu0 %v901_v5  ;;  %890 = vmatpush3.bf16.msra.mxu1 %v901_v5  ;;  %v95_v33 = vpack.c.bf16 %v51_v29, %v49_v28  ;;  %v48_v36 = vld [vmem:[%s1216_s0 + $0x120] sm:$0xff]  ;;  %v50_v37 = vld [vmem:[%s1216_s0 + $0x130] sm:$0xff]  ;;  %v21_v38 = vld [vmem:[%s1216_s0 + $0x48] sm:$0xff]  ;;  %v78_v42 = vpack.c.bf16 %v18_v35, %v16_v34 }
   0xc   :  { %774 = vmatprep.subr.bf16.mxu0 %v902_v6  ;;  %883 = vmatprep.subr.bf16.mxu1 %v902_v6  ;;  %v23_v39 = vld [vmem:[%s1216_s0 + $0x58] sm:$0xff]  ;;  %v53_v40 = vld [vmem:[%s1216_s0 + $0x148] sm:$0xff]  ;;  %v94_v43 = vpack.c.bf16 %v50_v37, %v48_v36  ;;  %v20_v46 = vld [vmem:[%s1216_s0 + $0x40] sm:$0xff] }
   0xd   :  { %v55_v41 = vld [vmem:[%s1216_s0 + $0x158] sm:$0xff]  ;;  %v81_v44 = vpack.c.bf16 %v23_v39, %v21_v38  ;;  %v22_v47 = vld [vmem:[%s1216_s0 + $0x50] sm:$0xff]  ;;  %v52_v48 = vld [vmem:[%s1216_s0 + $0x140] sm:$0xff] }
   0xe   :  { %v97_v45 = vpack.c.bf16 %v55_v41, %v53_v40  ;;  %v54_v49 = vld [vmem:[%s1216_s0 + $0x150] sm:$0xff]  ;;  %v25_v50 = vld [vmem:[%s1216_s0 + $0x68] sm:$0xff]  ;;  %v27_v51 = vld [vmem:[%s1216_s0 + $0x78] sm:$0xff]  ;;  %v80_v54 = vpack.c.bf16 %v22_v47, %v20_v46 }
   0xf   :  { %775 = vmatpush3.bf16.msra.mxu0 %v903_v7  ;;  %891 = vmatpush3.bf16.msra.mxu1 %v903_v7  ;;  %v57_v52 = vld [vmem:[%s1216_s0 + $0x168] sm:$0xff]  ;;  %v59_v53 = vld [vmem:[%s1216_s0 + $0x178] sm:$0xff]  ;;  %v96_v55 = vpack.c.bf16 %v54_v49, %v52_v48  ;;  %v83_v56 = vpack.c.bf16 %v27_v51, %v25_v50  ;;  %v24_v58 = vld [vmem:[%s1216_s0 + $0x60] sm:$0xff] }
  0x10   :  { %776 = vmatprep.subr.bf16.mxu0 %v904_v8  ;;  %884 = vmatprep.subr.bf16.mxu1 %v904_v8  ;;  %v99_v57 = vpack.c.bf16 %v59_v53, %v57_v52  ;;  %v26_v59 = vld [vmem:[%s1216_s0 + $0x70] sm:$0xff]  ;;  %v56_v60 = vld [vmem:[%s1216_s0 + $0x160] sm:$0xff]  ;;  %v29_v62 = vld [vmem:[%s1216_s0 + $0x88] sm:$0xff] }
  0x11   :  { %v58_v61 = vld [vmem:[%s1216_s0 + $0x170] sm:$0xff]  ;;  %v31_v63 = vld [vmem:[%s1216_s0 + $0x98] sm:$0xff]  ;;  %v61_v0 = vld [vmem:[%s1216_s0 + $0x188] sm:$0xff]  ;;  %v82_v2 = vpack.c.bf16 %v26_v59, %v24_v58 }
  0x12   :  { %v63_v1 = vld [vmem:[%s1216_s0 + $0x198] sm:$0xff]  ;;  %v98_v3 = vpack.c.bf16 %v58_v61, %v56_v60  ;;  %v85_v4 = vpack.c.bf16 %v31_v63, %v29_v62  ;;  %v28_v6 = vld [vmem:[%s1216_s0 + $0x80] sm:$0xff]  ;;  %v30_v7 = vld [vmem:[%s1216_s0 + $0x90] sm:$0xff] }
  0x13   :  { %777 = vmatpush3.bf16.msra.mxu0 %v905_v9  ;;  %892 = vmatpush3.bf16.msra.mxu1 %v905_v9  ;;  %v101_v5 = vpack.c.bf16 %v63_v1, %v61_v0  ;;  %v60_v8 = vld [vmem:[%s1216_s0 + $0x180] sm:$0xff]  ;;  %v62_v9 = vld [vmem:[%s1216_s0 + $0x190] sm:$0xff]  ;;  %v35_v11 = vld [vmem:[%s1216_s0 + $0xb8] sm:$0xff]  ;;  %v84_v14 = vpack.c.bf16 %v30_v7, %v28_v6 }
  0x14   :  { %778 = vmatprep.subr.bf16.mxu0 %v906_v10  ;;  %885 = vmatprep.subr.bf16.mxu1 %v906_v10  ;;  %v33_v10 = vld [vmem:[%s1216_s0 + $0xa8] sm:$0xff]  ;;  %v67_v13 = vld [vmem:[%s1216_s0 + $0x1b8] sm:$0xff]  ;;  %v100_v15 = vpack.c.bf16 %v62_v9, %v60_v8 }
  0x15   :  { %v65_v12 = vld [vmem:[%s1216_s0 + $0x1a8] sm:$0xff]  ;;  %v87_v16 = vpack.c.bf16 %v35_v11, %v33_v10  ;;  %v39_v23 = vld [vmem:[%s1216_s0 + $0xd8] sm:$0xff] }
  0x16   :  { %v37_v22 = vld [vmem:[%s1216_s0 + $0xc8] sm:$0xff]  ;;  %v71_v25 = vld [vmem:[%s1216_s0 + $0x1d8] sm:$0xff] }
  0x17   :  { %779 = vmatpush3.bf16.msra.mxu0 %v907_v17  ;;  %893 = vmatpush3.bf16.msra.mxu1 %v907_v17  ;;  %v103_v17 = vpack.c.bf16 %v67_v13, %v65_v12  ;;  %v69_v24 = vld [vmem:[%s1216_s0 + $0x1c8] sm:$0xff]  ;;  %v89_v28 = vpack.c.bf16 %v39_v23, %v37_v22  ;;  %v43_v35 = vld [vmem:[%s1216_s0 + $0xf8] sm:$0xff] }
  0x18   :  { %780 = vmatprep.subr.bf16.mxu0 %v908_v18  ;;  %886 = vmatprep.subr.bf16.mxu1 %v908_v18  ;;  %v32_v18 = vld [vmem:[%s1216_s0 + $0xa0] sm:$0xff]  ;;  %v105_v29 = vpack.c.bf16 %v71_v25, %v69_v24  ;;  %v41_v34 = vld [vmem:[%s1216_s0 + $0xe8] sm:$0xff]  ;;  %v75_v37 = vld [vmem:[%s1216_s0 + $0x1f8] sm:$0xff] }
  0x19   :  { %v73_v36 = vld [vmem:[%s1216_s0 + $0x1e8] sm:$0xff]  ;;  %v91_v40 = vpack.c.bf16 %v43_v35, %v41_v34 }
  0x1a   :  { %v107_v41 = vpack.c.bf16 %v75_v37, %v73_v36 }
  0x1b   :  { %781 = vmatpush3.bf16.msra.mxu0 %v909_v19  ;;  %894 = vmatpush3.bf16.msra.mxu1 %v909_v19  ;;  %v34_v19 = vld [vmem:[%s1216_s0 + $0xb0] sm:$0xff] }
  0x1c   :  { %782 = vmatprep.subr.bf16.mxu0 %v910_v20  ;;  %887 = vmatprep.subr.bf16.mxu1 %v910_v20  ;;  %v64_v20 = vld [vmem:[%s1216_s0 + $0x1a0] sm:$0xff]  ;;  %v86_v26 = vpack.c.bf16 %v34_v19, %v32_v18 }
  0x1f   :  { %783 = vmatpush3.bf16.msra.mxu0 %v911_v21  ;;  %895 = vmatpush3.bf16.msra.mxu1 %v911_v21  ;;  %v66_v21 = vld [vmem:[%s1216_s0 + $0x1b0] sm:$0xff] }
  0x20   :  { %v102_v27 = vpack.c.bf16 %v66_v21, %v64_v20 }
  0x22   :  { %269 = vmatmul.mubr.bf16.vlgmr.msra.gmra.mrb[0].mxu0 %v76_v30  ;;  %333 = vmatmul.mubr.bf16.vlgmr.msra.gmra.mrb[0].mxu1 %v92_v31  ;;  %v36_v30 = vld [vmem:[%s1216_s0 + $0xc0] sm:$0xff]  ;;  %v38_v31 = vld [vmem:[%s1216_s0 + $0xd0] sm:$0xff] }
  0x23   :  { %276 = vmatprep.mubr.bf16.mxu0 %v79_v32  ;;  %340 = vmatprep.mubr.bf16.mxu1 %v95_v33  ;;  %v68_v32 = vld [vmem:[%s1216_s0 + $0x1c0] sm:$0xff]  ;;  %v70_v33 = vld [vmem:[%s1216_s0 + $0x1d0] sm:$0xff]  ;;  %v88_v38 = vpack.c.bf16 %v38_v31, %v36_v30 }
  0x24   :  { %v104_v39 = vpack.c.bf16 %v70_v33, %v68_v32 }
  0x2a   :  { %277 = vmatmul.mubr.bf16.gmra.mrb[4].mxu0 %v78_v42  ;;  %341 = vmatmul.mubr.bf16.gmra.mrb[4].mxu1 %v94_v43  ;;  %v40_v42 = vld [vmem:[%s1216_s0 + $0xe0] sm:$0xff]  ;;  %v42_v43 = vld [vmem:[%s1216_s0 + $0xf0] sm:$0xff] }
  0x2b   :  { %284 = vmatprep.mubr.bf16.mxu0 %v81_v44  ;;  %348 = vmatprep.mubr.bf16.mxu1 %v97_v45  ;;  %v72_v44 = vld [vmem:[%s1216_s0 + $0x1e0] sm:$0xff]  ;;  %v74_v45 = vld [vmem:[%s1216_s0 + $0x1f0] sm:$0xff]  ;;  %v90_v46 = vpack.c.bf16 %v42_v43, %v40_v42 }
  0x2c   :  { %v106_v47 = vpack.c.bf16 %v74_v45, %v72_v44 }
  0x32   :  { %285 = vmatmul.mubr.bf16.gmra.mrb[8].mxu0 %v80_v54  ;;  %349 = vmatmul.mubr.bf16.gmra.mrb[8].mxu1 %v96_v55 }
  0x33   :  { %292 = vmatprep.mubr.bf16.mxu0 %v83_v56  ;;  %356 = vmatprep.mubr.bf16.mxu1 %v99_v57 }
  0x3a   :  { %293 = vmatmul.mubr.bf16.gmra.mrb[12].mxu0 %v82_v2  ;;  %357 = vmatmul.mubr.bf16.gmra.mrb[12].mxu1 %v98_v3 }
  0x3b   :  { %300 = vmatprep.mubr.bf16.mxu0 %v85_v4  ;;  %364 = vmatprep.mubr.bf16.mxu1 %v101_v5 }
  0x42   :  { %301 = vmatmul.mubr.bf16.gmra.mrb[16].mxu0 %v84_v14  ;;  %365 = vmatmul.mubr.bf16.gmra.mrb[16].mxu1 %v100_v15 }
  0x43   :  { %308 = vmatprep.mubr.bf16.mxu0 %v87_v16  ;;  %372 = vmatprep.mubr.bf16.mxu1 %v103_v17 }
  0x4a   :  { %309 = vmatmul.mubr.bf16.gmra.mrb[20].mxu0 %v86_v26  ;;  %373 = vmatmul.mubr.bf16.gmra.mrb[20].mxu1 %v102_v27 }
  0x4b   :  { %316 = vmatprep.mubr.bf16.mxu0 %v89_v28  ;;  %380 = vmatprep.mubr.bf16.mxu1 %v105_v29 }
  0x52   :  { %317 = vmatmul.mubr.bf16.gmra.mrb[24].mxu0 %v88_v38  ;;  %381 = vmatmul.mubr.bf16.gmra.mrb[24].mxu1 %v104_v39 }
  0x53   :  { %324 = vmatprep.mubr.bf16.mxu0 %v91_v40  ;;  %388 = vmatprep.mubr.bf16.mxu1 %v107_v41 }
  0x5a   :  { %325 = vmatmul.mubr.bf16.gmra.mrb[28].mxu0 %v90_v46  ;;  %389 = vmatmul.mubr.bf16.gmra.mrb[28].mxu1 %v106_v47 }
  0xf5   :  { %v784_v48 = vpop.f32.mrb[0].mxu0  ;;  %v832_v49 = vpop.f32.mrb[0].mxu1 }
  0xf6   :  { %v785_v50 = vpop.f32.mrb[1].mxu0  ;;  %v833_v51 = vpop.f32.mrb[1].mxu1 }
  0xf7   :  { %v786_v52 = vadd.f32 %v785_v50, %v784_v48  ;;  %v834_v53 = vadd.f32 %v833_v51, %v832_v49  ;;  %v787_v54 = vpop.f32.mrb[2].mxu0  ;;  %v835_v55 = vpop.f32.mrb[2].mxu1 }
  0xf8   :  { %v788_v56 = vpop.f32.mrb[3].mxu0  ;;  %v836_v57 = vpop.f32.mrb[3].mxu1 }
  0xf9   :  { %v789_v58 = vadd.f32 %v788_v56, %v787_v54  ;;  %v837_v59 = vadd.f32 %v836_v57, %v835_v55  ;;  %v397_v60 = vmax.f32 %v786_v52, 0.0  ;;  %v413_v61 = vmax.f32 %v834_v53, 0.0 }
  0xfb   :  { %v398_v62 = vmax.f32 %v789_v58, 0.0  ;;  %v414_v63 = vmax.f32 %v837_v59, 0.0 }
  0xfd   :  { %v676_v0 = vpack.c.bf16 %v398_v62, %v397_v60  ;;  %v716_v1 = vpack.c.bf16 %v414_v63, %v413_v61  ;;  %v790_v2 = vpop.f32.mrb[4].mxu0  ;;  %v838_v3 = vpop.f32.mrb[4].mxu1 }
  0xfe   :  { %v791_v4 = vpop.f32.mrb[5].mxu0  ;;  %v839_v5 = vpop.f32.mrb[5].mxu1 }
  0xff   :  { %677 = vst [vmem:[%s1217_s2] sm:$0xff] %v676_v0   ;;  %760 = vst [vmem:[%s1217_s2 + $0x40] sm:$0xff] %v716_v1   ;;  %v792_v6 = vadd.f32 %v791_v4, %v790_v2  ;;  %v840_v7 = vadd.f32 %v839_v5, %v838_v3  ;;  %v793_v8 = vpop.f32.mrb[6].mxu0  ;;  %v841_v9 = vpop.f32.mrb[6].mxu1 }
 0x100   :  { %v794_v10 = vpop.f32.mrb[7].mxu0  ;;  %v842_v11 = vpop.f32.mrb[7].mxu1 }
 0x101   :  { %v795_v12 = vadd.f32 %v794_v10, %v793_v8  ;;  %v843_v13 = vadd.f32 %v842_v11, %v841_v9  ;;  %v399_v14 = vmax.f32 %v792_v6, 0.0  ;;  %v415_v15 = vmax.f32 %v840_v7, 0.0 }
 0x103   :  { %v400_v16 = vmax.f32 %v795_v12, 0.0  ;;  %v416_v17 = vmax.f32 %v843_v13, 0.0 }
 0x105   :  { %v681_v18 = vpack.c.bf16 %v400_v16, %v399_v14  ;;  %v721_v19 = vpack.c.bf16 %v416_v17, %v415_v15  ;;  %v796_v20 = vpop.f32.mrb[8].mxu0  ;;  %v844_v21 = vpop.f32.mrb[8].mxu1 }
 0x106   :  { %v797_v22 = vpop.f32.mrb[9].mxu0  ;;  %v845_v23 = vpop.f32.mrb[9].mxu1 }
 0x107   :  { %753 = vst [vmem:[%s1217_s2 + $0x8] sm:$0xff] %v681_v18   ;;  %761 = vst [vmem:[%s1217_s2 + $0x48] sm:$0xff] %v721_v19   ;;  %v798_v24 = vadd.f32 %v797_v22, %v796_v20  ;;  %v846_v25 = vadd.f32 %v845_v23, %v844_v21  ;;  %v799_v26 = vpop.f32.mrb[10].mxu0  ;;  %v847_v27 = vpop.f32.mrb[10].mxu1 }
 0x108   :  { %v800_v28 = vpop.f32.mrb[11].mxu0  ;;  %v848_v29 = vpop.f32.mrb[11].mxu1 }
 0x109   :  { %v801_v30 = vadd.f32 %v800_v28, %v799_v26  ;;  %v849_v31 = vadd.f32 %v848_v29, %v847_v27  ;;  %v401_v32 = vmax.f32 %v798_v24, 0.0  ;;  %v417_v33 = vmax.f32 %v846_v25, 0.0 }
 0x10b   :  { %v402_v34 = vmax.f32 %v801_v30, 0.0  ;;  %v418_v35 = vmax.f32 %v849_v31, 0.0 }
 0x10d   :  { %v686_v36 = vpack.c.bf16 %v402_v34, %v401_v32  ;;  %v726_v37 = vpack.c.bf16 %v418_v35, %v417_v33  ;;  %v802_v38 = vpop.f32.mrb[12].mxu0  ;;  %v850_v39 = vpop.f32.mrb[12].mxu1 }
 0x10e   :  { %v803_v40 = vpop.f32.mrb[13].mxu0  ;;  %v851_v41 = vpop.f32.mrb[13].mxu1 }
 0x10f   :  { %754 = vst [vmem:[%s1217_s2 + $0x10] sm:$0xff] %v686_v36   ;;  %762 = vst [vmem:[%s1217_s2 + $0x50] sm:$0xff] %v726_v37   ;;  %v804_v42 = vadd.f32 %v803_v40, %v802_v38  ;;  %v852_v43 = vadd.f32 %v851_v41, %v850_v39  ;;  %v805_v44 = vpop.f32.mrb[14].mxu0  ;;  %v853_v45 = vpop.f32.mrb[14].mxu1 }
 0x110   :  { %v806_v46 = vpop.f32.mrb[15].mxu0  ;;  %v854_v47 = vpop.f32.mrb[15].mxu1 }
 0x111   :  { %v807_v48 = vadd.f32 %v806_v46, %v805_v44  ;;  %v855_v49 = vadd.f32 %v854_v47, %v853_v45  ;;  %v403_v50 = vmax.f32 %v804_v42, 0.0  ;;  %v419_v51 = vmax.f32 %v852_v43, 0.0 }
 0x113   :  { %v404_v52 = vmax.f32 %v807_v48, 0.0  ;;  %v420_v53 = vmax.f32 %v855_v49, 0.0 }
 0x115   :  { %v691_v54 = vpack.c.bf16 %v404_v52, %v403_v50  ;;  %v731_v55 = vpack.c.bf16 %v420_v53, %v419_v51  ;;  %v808_v56 = vpop.f32.mrb[16].mxu0  ;;  %v856_v57 = vpop.f32.mrb[16].mxu1 }
 0x116   :  { %v809_v58 = vpop.f32.mrb[17].mxu0  ;;  %v857_v59 = vpop.f32.mrb[17].mxu1 }
 0x117   :  { %755 = vst [vmem:[%s1217_s2 + $0x18] sm:$0xff] %v691_v54   ;;  %763 = vst [vmem:[%s1217_s2 + $0x58] sm:$0xff] %v731_v55   ;;  %v810_v60 = vadd.f32 %v809_v58, %v808_v56  ;;  %v858_v61 = vadd.f32 %v857_v59, %v856_v57  ;;  %v811_v62 = vpop.f32.mrb[18].mxu0  ;;  %v859_v63 = vpop.f32.mrb[18].mxu1 }
 0x118   :  { %v812_v0 = vpop.f32.mrb[19].mxu0  ;;  %v860_v1 = vpop.f32.mrb[19].mxu1 }
 0x119   :  { %v813_v2 = vadd.f32 %v812_v0, %v811_v62  ;;  %v861_v3 = vadd.f32 %v860_v1, %v859_v63  ;;  %v405_v4 = vmax.f32 %v810_v60, 0.0  ;;  %v421_v5 = vmax.f32 %v858_v61, 0.0 }
 0x11b   :  { %v406_v6 = vmax.f32 %v813_v2, 0.0  ;;  %v422_v7 = vmax.f32 %v861_v3, 0.0 }
 0x11d   :  { %v696_v8 = vpack.c.bf16 %v406_v6, %v405_v4  ;;  %v736_v9 = vpack.c.bf16 %v422_v7, %v421_v5  ;;  %v814_v10 = vpop.f32.mrb[20].mxu0  ;;  %v862_v11 = vpop.f32.mrb[20].mxu1 }
 0x11e   :  { %v815_v12 = vpop.f32.mrb[21].mxu0  ;;  %v863_v13 = vpop.f32.mrb[21].mxu1 }
 0x11f   :  { %756 = vst [vmem:[%s1217_s2 + $0x20] sm:$0xff] %v696_v8   ;;  %764 = vst [vmem:[%s1217_s2 + $0x60] sm:$0xff] %v736_v9   ;;  %v816_v14 = vadd.f32 %v815_v12, %v814_v10  ;;  %v864_v15 = vadd.f32 %v863_v13, %v862_v11  ;;  %v817_v16 = vpop.f32.mrb[22].mxu0  ;;  %v865_v17 = vpop.f32.mrb[22].mxu1 }
 0x120   :  { %v818_v18 = vpop.f32.mrb[23].mxu0  ;;  %v866_v19 = vpop.f32.mrb[23].mxu1 }
 0x121   :  { %v819_v20 = vadd.f32 %v818_v18, %v817_v16  ;;  %v867_v21 = vadd.f32 %v866_v19, %v865_v17  ;;  %v407_v22 = vmax.f32 %v816_v14, 0.0  ;;  %v423_v23 = vmax.f32 %v864_v15, 0.0 }
 0x123   :  { %v408_v24 = vmax.f32 %v819_v20, 0.0  ;;  %v424_v25 = vmax.f32 %v867_v21, 0.0 }
 0x125   :  { %v701_v26 = vpack.c.bf16 %v408_v24, %v407_v22  ;;  %v741_v27 = vpack.c.bf16 %v424_v25, %v423_v23  ;;  %v820_v28 = vpop.f32.mrb[24].mxu0  ;;  %v868_v29 = vpop.f32.mrb[24].mxu1 }
 0x126   :  { %v821_v30 = vpop.f32.mrb[25].mxu0  ;;  %v869_v31 = vpop.f32.mrb[25].mxu1 }
 0x127   :  { %757 = vst [vmem:[%s1217_s2 + $0x28] sm:$0xff] %v701_v26   ;;  %765 = vst [vmem:[%s1217_s2 + $0x68] sm:$0xff] %v741_v27   ;;  %v822_v32 = vadd.f32 %v821_v30, %v820_v28  ;;  %v870_v33 = vadd.f32 %v869_v31, %v868_v29  ;;  %v823_v34 = vpop.f32.mrb[26].mxu0  ;;  %v871_v35 = vpop.f32.mrb[26].mxu1 }
 0x128   :  { %v824_v36 = vpop.f32.mrb[27].mxu0  ;;  %v872_v37 = vpop.f32.mrb[27].mxu1 }
 0x129   :  { %v825_v38 = vadd.f32 %v824_v36, %v823_v34  ;;  %v873_v39 = vadd.f32 %v872_v37, %v871_v35  ;;  %v409_v40 = vmax.f32 %v822_v32, 0.0  ;;  %v425_v41 = vmax.f32 %v870_v33, 0.0 }
 0x12b   :  { %v410_v42 = vmax.f32 %v825_v38, 0.0  ;;  %v426_v43 = vmax.f32 %v873_v39, 0.0 }
 0x12d   :  { %v706_v44 = vpack.c.bf16 %v410_v42, %v409_v40  ;;  %v746_v45 = vpack.c.bf16 %v426_v43, %v425_v41  ;;  %v826_v46 = vpop.f32.mrb[28].mxu0  ;;  %v874_v47 = vpop.f32.mrb[28].mxu1 }
 0x12e   :  { %v827_v48 = vpop.f32.mrb[29].mxu0  ;;  %v875_v49 = vpop.f32.mrb[29].mxu1 }
 0x12f   :  { %758 = vst [vmem:[%s1217_s2 + $0x30] sm:$0xff] %v706_v44   ;;  %766 = vst [vmem:[%s1217_s2 + $0x70] sm:$0xff] %v746_v45   ;;  %v828_v50 = vadd.f32 %v827_v48, %v826_v46  ;;  %v876_v51 = vadd.f32 %v875_v49, %v874_v47  ;;  %v829_v52 = vpop.f32.mrb[30].mxu0  ;;  %v877_v53 = vpop.f32.mrb[30].mxu1 }
 0x130   :  { %v830_v54 = vpop.f32.mrb[31].mxu0  ;;  %v878_v55 = vpop.f32.mrb[31].mxu1 }
 0x131   :  { %v831_v56 = vadd.f32 %v830_v54, %v829_v52  ;;  %v879_v57 = vadd.f32 %v878_v55, %v877_v53  ;;  %v411_v58 = vmax.f32 %v828_v50, 0.0  ;;  %v427_v59 = vmax.f32 %v876_v51, 0.0 }
 0x133   :  { %v412_v60 = vmax.f32 %v831_v56, 0.0  ;;  %v428_v61 = vmax.f32 %v879_v57, 0.0 }
 0x135   :  { %v711_v62 = vpack.c.bf16 %v412_v60, %v411_v58  ;;  %v751_v63 = vpack.c.bf16 %v428_v61, %v427_v59 }
 0x137   :  { %759 = vst [vmem:[%s1217_s2 + $0x38] sm:$0xff] %v711_v62   ;;  %767 = vst [vmem:[%s1217_s2 + $0x78] sm:$0xff] %v751_v63  }

// kernel: vgae_forward.6
= control target key start
LH: loop header
LB: loop body
LE: loop exit
PB: predicated region body
PF: predicated region fallthrough
CT: control target
= control target key end

     0   :  { %s1475_s1 = inlined_call_operand.vmem [shape: bf16[256,128], index: 1, kind: input, shape index: {}]   ;;  %s1476_s0 = inlined_call_operand.vmem [shape: f32[256,256], index: 0, kind: input, shape index: {}]   ;;  %s1477_s2 = inlined_call_operand.vmem [shape: bf16[128,256], index: 2, kind: input, shape index: {}]   ;;  %s1478_s3 = inlined_call_operand.vmem [shape: f32[256,256], index: 3, kind: output, shape index: {}]  }
   0x1   :  { %v918_v0 = vld [vmem:[%s1475_s1 + $0x40] sm:$0xff]   ;;  %v920_v2 = vld [vmem:[%s1475_s1 + $0x48] sm:$0xff]   ;;  %v922_v4 = vld [vmem:[%s1475_s1 + $0x50] sm:$0xff]  }
   0x2   :  { %v919_v1 = vld [vmem:[%s1475_s1] sm:$0xff]   ;;  %805 = vmatprep.subr.bf16.mxu0 %v918_v0  ;;  %v921_v3 = vld [vmem:[%s1475_s1 + $0x8] sm:$0xff]   ;;  %v923_v5 = vld [vmem:[%s1475_s1 + $0x10] sm:$0xff]  }
   0x3   :  { %806 = vmatpush3.bf16.msra.mxu0 %v919_v1  ;;  %v924_v6 = vld [vmem:[%s1475_s1 + $0x58] sm:$0xff]   ;;  %v926_v8 = vld [vmem:[%s1475_s1 + $0x60] sm:$0xff]   ;;  %v928_v10 = vld [vmem:[%s1475_s1 + $0x68] sm:$0xff]  }
   0x4   :  { %807 = vmatprep.subr.bf16.mxu0 %v920_v2  ;;  %v925_v7 = vld [vmem:[%s1475_s1 + $0x18] sm:$0xff]   ;;  %v927_v9 = vld [vmem:[%s1475_s1 + $0x20] sm:$0xff]   ;;  %v16_v11 = vld [vmem:[%s1476_s0 + $0x8] sm:$0xff] }
   0x5   :  { %v18_v12 = vld [vmem:[%s1476_s0 + $0x18] sm:$0xff]  ;;  %v929_v14 = vld [vmem:[%s1475_s1 + $0x28] sm:$0xff]   ;;  %v930_v15 = vld [vmem:[%s1475_s1 + $0x70] sm:$0xff]  }
   0x6   :  { %v80_v13 = vpack.c.bf16 %v18_v12, %v16_v11  ;;  %v931_v16 = vld [vmem:[%s1475_s1 + $0x30] sm:$0xff]   ;;  %v932_v17 = vld [vmem:[%s1475_s1 + $0x78] sm:$0xff]   ;;  %v15_v19 = vld [vmem:[%s1476_s0] sm:$0xff] }
   0x7   :  { %808 = vmatpush3.bf16.msra.mxu0 %v921_v3  ;;  %v933_v18 = vld [vmem:[%s1475_s1 + $0x38] sm:$0xff]   ;;  %v17_v20 = vld [vmem:[%s1476_s0 + $0x10] sm:$0xff]  ;;  %v20_v21 = vld [vmem:[%s1476_s0 + $0x28] sm:$0xff] }
   0x8   :  { %809 = vmatprep.subr.bf16.mxu0 %v922_v4  ;;  %271 = vmatprep.mubr.bf16.mxu0 %v80_v13  ;;  %v22_v22 = vld [vmem:[%s1476_s0 + $0x38] sm:$0xff]  ;;  %v79_v23 = vpack.c.bf16 %v17_v20, %v15_v19  ;;  %v19_v25 = vld [vmem:[%s1476_s0 + $0x20] sm:$0xff]  ;;  %v21_v26 = vld [vmem:[%s1476_s0 + $0x30] sm:$0xff] }
   0x9   :  { %v82_v24 = vpack.c.bf16 %v22_v22, %v20_v21  ;;  %v24_v27 = vld [vmem:[%s1476_s0 + $0x48] sm:$0xff]  ;;  %v26_v28 = vld [vmem:[%s1476_s0 + $0x58] sm:$0xff]  ;;  %v81_v29 = vpack.c.bf16 %v21_v26, %v19_v25  ;;  %v23_v35 = vld [vmem:[%s1476_s0 + $0x40] sm:$0xff] }
   0xa   :  { %v934_v30 = vld [vmem:[%s1477_s2 + $0x4] ss:$8 sps:$4 sm:$0xff]   ;;  %v936_v31 = vld [vmem:[%s1477_s2] ss:$8 sps:$4 sm:$0xff]   ;;  %v84_v32 = vpack.c.bf16 %v26_v28, %v24_v27  ;;  %v937_v33 = vld [vmem:[%s1477_s2 + $0x14] ss:$8 sps:$4 sm:$0xff]  }
   0xb   :  { %810 = vmatpush3.bf16.msra.mxu0 %v923_v5  ;;  %512 = vmatprep.subr.bf16.mxu1 %v934_v30  ;;  %v939_v34 = vld [vmem:[%s1477_s2 + $0x10] ss:$8 sps:$4 sm:$0xff]   ;;  %v940_v36 = vld [vmem:[%s1477_s2 + $0x24] ss:$8 sps:$4 sm:$0xff]   ;;  %v942_v40 = vld [vmem:[%s1477_s2 + $0x20] ss:$8 sps:$4 sm:$0xff]  }
   0xc   :  { %811 = vmatprep.subr.bf16.mxu0 %v924_v6  ;;  %513 = vmatpush1.bf16.msra.mxu1 %v936_v31  ;;  %v25_v37 = vld [vmem:[%s1476_s0 + $0x50] sm:$0xff]  ;;  %v28_v38 = vld [vmem:[%s1476_s0 + $0x68] sm:$0xff]  ;;  %v30_v39 = vld [vmem:[%s1476_s0 + $0x78] sm:$0xff] }
   0xd   :  { %514 = vmatprep.subr.bf16.mxu1 %v937_v33  ;;  %v83_v41 = vpack.c.bf16 %v25_v37, %v23_v35  ;;  %v943_v42 = vld [vmem:[%s1477_s2 + $0x34] ss:$8 sps:$4 sm:$0xff]   ;;  %v86_v43 = vpack.c.bf16 %v30_v39, %v28_v38  ;;  %v945_v44 = vld [vmem:[%s1477_s2 + $0x30] ss:$8 sps:$4 sm:$0xff]   ;;  %v946_v45 = vld [vmem:[%s1477_s2 + $0x44] ss:$8 sps:$4 sm:$0xff]  }
   0xe   :  { %v27_v46 = vld [vmem:[%s1476_s0 + $0x60] sm:$0xff]  ;;  %v29_v47 = vld [vmem:[%s1476_s0 + $0x70] sm:$0xff]  ;;  %v32_v48 = vld [vmem:[%s1476_s0 + $0x88] sm:$0xff] }
   0xf   :  { %812 = vmatpush3.bf16.msra.mxu0 %v925_v7  ;;  %v34_v49 = vld [vmem:[%s1476_s0 + $0x98] sm:$0xff]  ;;  %v948_v50 = vld [vmem:[%s1477_s2 + $0x40] ss:$8 sps:$4 sm:$0xff]   ;;  %v85_v51 = vpack.c.bf16 %v29_v47, %v27_v46  ;;  %v33_v56 = vld [vmem:[%s1476_s0 + $0x90] sm:$0xff]  ;;  %v958_v47 = vmov 0  }
  0x10   :  { %813 = vmatprep.subr.bf16.mxu0 %v926_v8  ;;  %515 = vmatpush1.bf16.msra.mxu1 %v939_v34  ;;  %v949_v52 = vld [vmem:[%s1477_s2 + $0x54] ss:$8 sps:$4 sm:$0xff]   ;;  %v88_v53 = vpack.c.bf16 %v34_v49, %v32_v48  ;;  %v951_v54 = vld [vmem:[%s1477_s2 + $0x50] ss:$8 sps:$4 sm:$0xff]   ;;  %v31_v55 = vld [vmem:[%s1476_s0 + $0x80] sm:$0xff] }
  0x11   :  { %516 = vmatprep.subr.bf16.mxu1 %v940_v36  ;;  %v36_v57 = vld [vmem:[%s1476_s0 + $0xa8] sm:$0xff]  ;;  %v38_v58 = vld [vmem:[%s1476_s0 + $0xb8] sm:$0xff]  ;;  %v87_v59 = vpack.c.bf16 %v33_v56, %v31_v55  ;;  %v35_v61 = vld [vmem:[%s1476_s0 + $0xa0] sm:$0xff]  ;;  %544 = vmatprep.mubr.bf16.mxu1 %v958_v47 }
  0x12   :  { %v90_v60 = vpack.c.bf16 %v38_v58, %v36_v57  ;;  %v37_v62 = vld [vmem:[%s1476_s0 + $0xb0] sm:$0xff]  ;;  %v40_v63 = vld [vmem:[%s1476_s0 + $0xc8] sm:$0xff]  ;;  %v42_v0 = vld [vmem:[%s1476_s0 + $0xd8] sm:$0xff] }
  0x13   :  { %814 = vmatpush3.bf16.msra.mxu0 %v927_v9  ;;  %v89_v1 = vpack.c.bf16 %v37_v62, %v35_v61  ;;  %v92_v2 = vpack.c.bf16 %v42_v0, %v40_v63  ;;  %v39_v3 = vld [vmem:[%s1476_s0 + $0xc0] sm:$0xff]  ;;  %v41_v4 = vld [vmem:[%s1476_s0 + $0xd0] sm:$0xff]  ;;  %v44_v5 = vld [vmem:[%s1476_s0 + $0xe8] sm:$0xff] }
  0x14   :  { %815 = vmatprep.subr.bf16.mxu0 %v928_v10  ;;  %517 = vmatpush1.bf16.msra.mxu1 %v942_v40  ;;  %v46_v6 = vld [vmem:[%s1476_s0 + $0xf8] sm:$0xff]  ;;  %v91_v7 = vpack.c.bf16 %v41_v4, %v39_v3  ;;  %v43_v9 = vld [vmem:[%s1476_s0 + $0xe0] sm:$0xff]  ;;  %v45_v10 = vld [vmem:[%s1476_s0 + $0xf0] sm:$0xff] }
  0x15   :  { %518 = vmatprep.subr.bf16.mxu1 %v943_v42  ;;  %v94_v8 = vpack.c.bf16 %v46_v6, %v44_v5  ;;  %v48_v11 = vld [vmem:[%s1476_s0 + $0x108] sm:$0xff]  ;;  %v50_v12 = vld [vmem:[%s1476_s0 + $0x118] sm:$0xff]  ;;  %v93_v13 = vpack.c.bf16 %v45_v10, %v43_v9  ;;  %v51_v21 = vld [vmem:[%s1476_s0 + $0x120] sm:$0xff] }
  0x16   :  { %v53_v22 = vld [vmem:[%s1476_s0 + $0x130] sm:$0xff]  ;;  %v55_v27 = vld [vmem:[%s1476_s0 + $0x140] sm:$0xff]  ;;  %v62_v30 = vld [vmem:[%s1476_s0 + $0x178] sm:$0xff] }
  0x17   :  { %816 = vmatpush3.bf16.msra.mxu0 %v929_v14  ;;  %v96_v14 = vpack.c.bf16 %v50_v12, %v48_v11  ;;  %v97_v25 = vpack.c.bf16 %v53_v22, %v51_v21  ;;  %v57_v28 = vld [vmem:[%s1476_s0 + $0x150] sm:$0xff]  ;;  %v59_v33 = vld [vmem:[%s1476_s0 + $0x160] sm:$0xff]  ;;  %v64_v36 = vld [vmem:[%s1476_s0 + $0x188] sm:$0xff] }
  0x18   :  { %817 = vmatprep.subr.bf16.mxu0 %v930_v15  ;;  %519 = vmatpush1.bf16.msra.mxu1 %v945_v44  ;;  %v47_v15 = vld [vmem:[%s1476_s0 + $0x100] sm:$0xff]  ;;  %v99_v31 = vpack.c.bf16 %v57_v28, %v55_v27  ;;  %v61_v34 = vld [vmem:[%s1476_s0 + $0x170] sm:$0xff]  ;;  %v66_v37 = vld [vmem:[%s1476_s0 + $0x198] sm:$0xff] }
  0x19   :  { %520 = vmatprep.subr.bf16.mxu1 %v946_v45  ;;  %v952_v35 = vld [vmem:[%s1477_s2 + $0x64] ss:$8 sps:$4 sm:$0xff]   ;;  %v954_v38 = vld [vmem:[%s1477_s2 + $0x60] ss:$8 sps:$4 sm:$0xff]   ;;  %v101_v39 = vpack.c.bf16 %v61_v34, %v59_v33  ;;  %v104_v40 = vpack.c.bf16 %v66_v37, %v64_v36  ;;  %v957_v42 = vld [vmem:[%s1477_s2 + $0x70] ss:$8 sps:$4 sm:$0xff]  }
  0x1a   :  { %v65_v44 = vld [vmem:[%s1476_s0 + $0x190] sm:$0xff]  ;;  %v68_v45 = vld [vmem:[%s1476_s0 + $0x1a8] sm:$0xff]  ;;  %v70_v46 = vld [vmem:[%s1476_s0 + $0x1b8] sm:$0xff] }
  0x1b   :  { %818 = vmatpush3.bf16.msra.mxu0 %v931_v16  ;;  %v49_v16 = vld [vmem:[%s1476_s0 + $0x110] sm:$0xff]  ;;  %v106_v49 = vpack.c.bf16 %v70_v46, %v68_v45  ;;  %v71_v56 = vld [vmem:[%s1476_s0 + $0x1c0] sm:$0xff]  ;;  %v76_v58 = vld [vmem:[%s1476_s0 + $0x1e8] sm:$0xff] }
  0x1c   :  { %819 = vmatprep.subr.bf16.mxu0 %v932_v17  ;;  %521 = vmatpush1.bf16.msra.mxu1 %v948_v50  ;;  %v52_v17 = vld [vmem:[%s1476_s0 + $0x128] sm:$0xff]  ;;  %v95_v19 = vpack.c.bf16 %v49_v16, %v47_v15  ;;  %v67_v50 = vld [vmem:[%s1476_s0 + $0x1a0] sm:$0xff]  ;;  %v73_v57 = vld [vmem:[%s1476_s0 + $0x1d0] sm:$0xff] }
  0x1d   :  { %522 = vmatprep.subr.bf16.mxu1 %v949_v52  ;;  %v72_v52 = vld [vmem:[%s1476_s0 + $0x1c8] sm:$0xff]  ;;  %v75_v62 = vld [vmem:[%s1476_s0 + $0x1e0] sm:$0xff]  ;;  %v77_v63 = vld [vmem:[%s1476_s0 + $0x1f0] sm:$0xff] }
  0x1e   :  { %v109_v0 = vpack.c.bf16 %v77_v63, %v75_v62 }
  0x1f   :  { %820 = vmatpush3.bf16.msra.mxu0 %v933_v18  ;;  %v54_v18 = vld [vmem:[%s1476_s0 + $0x138] sm:$0xff] }
  0x20   :  { %523 = vmatpush1.bf16.msra.mxu1 %v951_v54  ;;  %v98_v20 = vpack.c.bf16 %v54_v18, %v52_v17 }
  0x21   :  { %524 = vmatprep.subr.bf16.mxu1 %v952_v35 }
  0x22   :  { %272 = vmatmul.mubr.bf16.vlgmr.msra.gmra.mrb[0].mxu0 %v79_v23  ;;  %v56_v23 = vld [vmem:[%s1476_s0 + $0x148] sm:$0xff] }
  0x23   :  { %279 = vmatprep.mubr.bf16.mxu0 %v82_v24  ;;  %v58_v24 = vld [vmem:[%s1476_s0 + $0x158] sm:$0xff] }
  0x24   :  { %v100_v26 = vpack.c.bf16 %v58_v24, %v56_v23  ;;  %525 = vmatpush1.bf16.msra.mxu1 %v954_v38 }
  0x2a   :  { %280 = vmatmul.mubr.bf16.gmra.mrb[4].mxu0 %v81_v29  ;;  %v60_v29 = vld [vmem:[%s1476_s0 + $0x168] sm:$0xff] }
  0x2b   :  { %287 = vmatprep.mubr.bf16.mxu0 %v84_v32  ;;  %v102_v32 = vpack.c.bf16 %v62_v30, %v60_v29 }
  0x32   :  { %288 = vmatmul.mubr.bf16.gmra.mrb[8].mxu0 %v83_v41  ;;  %v955_v41 = vld [vmem:[%s1477_s2 + $0x74] ss:$8 sps:$4 sm:$0xff]  }
  0x33   :  { %295 = vmatprep.mubr.bf16.mxu0 %v86_v43  ;;  %526 = vmatprep.subr.bf16.mxu1 %v955_v41  ;;  %v63_v43 = vld [vmem:[%s1476_s0 + $0x180] sm:$0xff] }
  0x34   :  { %527 = vmatpush1.bf16.msra.mxu1 %v957_v42  ;;  %v103_v48 = vpack.c.bf16 %v65_v44, %v63_v43 }
  0x3a   :  { %296 = vmatmul.mubr.bf16.gmra.mrb[12].mxu0 %v85_v51  ;;  %v69_v51 = vld [vmem:[%s1476_s0 + $0x1b0] sm:$0xff] }
  0x3b   :  { %303 = vmatprep.mubr.bf16.mxu0 %v88_v53  ;;  %v74_v53 = vld [vmem:[%s1476_s0 + $0x1d8] sm:$0xff]  ;;  %v105_v54 = vpack.c.bf16 %v69_v51, %v67_v50 }
  0x3c   :  { %v108_v55 = vpack.c.bf16 %v74_v53, %v72_v52 }
  0x42   :  { %304 = vmatmul.mubr.bf16.gmra.mrb[16].mxu0 %v87_v59  ;;  %v78_v59 = vld [vmem:[%s1476_s0 + $0x1f8] sm:$0xff] }
  0x43   :  { %311 = vmatprep.mubr.bf16.mxu0 %v90_v60  ;;  %v107_v60 = vpack.c.bf16 %v73_v57, %v71_v56  ;;  %v110_v61 = vpack.c.bf16 %v78_v59, %v76_v58 }
  0x4a   :  { %312 = vmatmul.mubr.bf16.gmra.mrb[20].mxu0 %v89_v1 }
  0x4b   :  { %319 = vmatprep.mubr.bf16.mxu0 %v92_v2 }
  0x52   :  { %320 = vmatmul.mubr.bf16.gmra.mrb[24].mxu0 %v91_v7 }
  0x53   :  { %327 = vmatprep.mubr.bf16.mxu0 %v94_v8 }
  0x5a   :  { %328 = vmatmul.mubr.bf16.gmra.mrb[28].mxu0 %v93_v13 }
  0x5b   :  { %335 = vmatprep.mubr.bf16.mxu0 %v96_v14 }
  0x62   :  { %336 = vmatmul.mubr.bf16.gmra.mrb[32].mxu0 %v95_v19 }
  0x63   :  { %343 = vmatprep.mubr.bf16.mxu0 %v98_v20 }
  0x6a   :  { %344 = vmatmul.mubr.bf16.gmra.mrb[36].mxu0 %v97_v25 }
  0x6b   :  { %351 = vmatprep.mubr.bf16.mxu0 %v100_v26 }
  0x72   :  { %352 = vmatmul.mubr.bf16.gmra.mrb[40].mxu0 %v99_v31 }
  0x73   :  { %359 = vmatprep.mubr.bf16.mxu0 %v102_v32 }
  0x7a   :  { %360 = vmatmul.mubr.bf16.gmra.mrb[44].mxu0 %v101_v39 }
  0x7b   :  { %367 = vmatprep.mubr.bf16.mxu0 %v104_v40 }
  0x82   :  { %368 = vmatmul.mubr.bf16.gmra.mrb[48].mxu0 %v103_v48 }
  0x83   :  { %375 = vmatprep.mubr.bf16.mxu0 %v106_v49 }
  0x8a   :  { %376 = vmatmul.mubr.bf16.gmra.mrb[52].mxu0 %v105_v54 }
  0x8b   :  { %383 = vmatprep.mubr.bf16.mxu0 %v108_v55 }
  0x92   :  { %384 = vmatmul.mubr.bf16.gmra.mrb[56].mxu0 %v107_v60 }
  0x93   :  { %391 = vmatprep.mubr.bf16.mxu0 %v110_v61 }
  0x9a   :  { %392 = vmatmul.mubr.bf16.gmra.mrb[60].mxu0 %v109_v0 }
  0xf5   :  { %v821_v1 = vpop.f32.mrb[0].mxu0 }
  0xf6   :  { %v822_v2 = vpop.f32.mrb[1].mxu0 }
  0xf7   :  { %v823_v3 = vadd.f32 %v822_v2, %v821_v1  ;;  %v824_v4 = vpop.f32.mrb[2].mxu0 }
  0xf8   :  { %v825_v5 = vpop.f32.mrb[3].mxu0 }
  0xf9   :  { %v826_v6 = vadd.f32 %v825_v5, %v824_v4 }
  0xfb   :  { %v400_v7 = vpack.c.bf16 %v826_v6, %v823_v3 }
  0xfd   :  { %v827_v8 = vpop.f32.mrb[4].mxu0  ;;  %545 = vmatmul.mubr.bf16.vlgmr.msra.gmra.mrb[0].mxu1 %v400_v7 }
  0xfe   :  { %v828_v9 = vpop.f32.mrb[5].mxu0  ;;  %554 = vmatprep.mubr.bf16.mxu1 %v958_v47 }
  0xff   :  { %v829_v10 = vadd.f32 %v828_v9, %v827_v8  ;;  %v830_v11 = vpop.f32.mrb[6].mxu0 }
 0x100   :  { %v831_v12 = vpop.f32.mrb[7].mxu0 }
 0x101   :  { %v832_v13 = vadd.f32 %v831_v12, %v830_v11 }
 0x103   :  { %v401_v14 = vpack.c.bf16 %v832_v13, %v829_v10 }
 0x105   :  { %v833_v15 = vpop.f32.mrb[8].mxu0  ;;  %555 = vmatmul.mubr.bf16.gmra.mrb[4].mxu1 %v401_v14 }
 0x106   :  { %v834_v16 = vpop.f32.mrb[9].mxu0  ;;  %564 = vmatprep.mubr.bf16.mxu1 %v958_v47 }
 0x107   :  { %v835_v17 = vadd.f32 %v834_v16, %v833_v15  ;;  %v836_v18 = vpop.f32.mrb[10].mxu0 }
 0x108   :  { %v837_v19 = vpop.f32.mrb[11].mxu0 }
 0x109   :  { %v838_v20 = vadd.f32 %v837_v19, %v836_v18 }
 0x10b   :  { %v402_v21 = vpack.c.bf16 %v838_v20, %v835_v17 }
 0x10d   :  { %v839_v22 = vpop.f32.mrb[12].mxu0  ;;  %565 = vmatmul.mubr.bf16.gmra.mrb[8].mxu1 %v402_v21 }
 0x10e   :  { %v840_v23 = vpop.f32.mrb[13].mxu0  ;;  %574 = vmatprep.mubr.bf16.mxu1 %v958_v47 }
 0x10f   :  { %v841_v24 = vadd.f32 %v840_v23, %v839_v22  ;;  %v842_v25 = vpop.f32.mrb[14].mxu0 }
 0x110   :  { %v843_v26 = vpop.f32.mrb[15].mxu0 }
 0x111   :  { %v844_v27 = vadd.f32 %v843_v26, %v842_v25 }
 0x113   :  { %v403_v28 = vpack.c.bf16 %v844_v27, %v841_v24 }
 0x115   :  { %v845_v29 = vpop.f32.mrb[16].mxu0  ;;  %575 = vmatmul.mubr.bf16.gmra.mrb[12].mxu1 %v403_v28 }
 0x116   :  { %v846_v30 = vpop.f32.mrb[17].mxu0  ;;  %584 = vmatprep.mubr.bf16.mxu1 %v958_v47 }
 0x117   :  { %v847_v31 = vadd.f32 %v846_v30, %v845_v29  ;;  %v848_v32 = vpop.f32.mrb[18].mxu0 }
 0x118   :  { %v849_v33 = vpop.f32.mrb[19].mxu0 }
 0x119   :  { %v850_v34 = vadd.f32 %v849_v33, %v848_v32 }
 0x11b   :  { %v404_v35 = vpack.c.bf16 %v850_v34, %v847_v31 }
 0x11d   :  { %v851_v36 = vpop.f32.mrb[20].mxu0  ;;  %585 = vmatmul.mubr.bf16.gmra.mrb[16].mxu1 %v404_v35 }
 0x11e   :  { %v852_v37 = vpop.f32.mrb[21].mxu0  ;;  %594 = vmatprep.mubr.bf16.mxu1 %v958_v47 }
 0x11f   :  { %v853_v38 = vadd.f32 %v852_v37, %v851_v36  ;;  %v854_v39 = vpop.f32.mrb[22].mxu0 }
 0x120   :  { %v855_v40 = vpop.f32.mrb[23].mxu0 }
 0x121   :  { %v856_v41 = vadd.f32 %v855_v40, %v854_v39 }
 0x123   :  { %v405_v42 = vpack.c.bf16 %v856_v41, %v853_v38 }
 0x125   :  { %v857_v43 = vpop.f32.mrb[24].mxu0  ;;  %595 = vmatmul.mubr.bf16.gmra.mrb[20].mxu1 %v405_v42 }
 0x126   :  { %v858_v44 = vpop.f32.mrb[25].mxu0  ;;  %604 = vmatprep.mubr.bf16.mxu1 %v958_v47 }
 0x127   :  { %v859_v45 = vadd.f32 %v858_v44, %v857_v43  ;;  %v860_v46 = vpop.f32.mrb[26].mxu0 }
 0x128   :  { %v861_v48 = vpop.f32.mrb[27].mxu0 }
 0x129   :  { %v862_v49 = vadd.f32 %v861_v48, %v860_v46 }
 0x12b   :  { %v406_v50 = vpack.c.bf16 %v862_v49, %v859_v45 }
 0x12d   :  { %v863_v51 = vpop.f32.mrb[28].mxu0  ;;  %605 = vmatmul.mubr.bf16.gmra.mrb[24].mxu1 %v406_v50 }
 0x12e   :  { %v864_v52 = vpop.f32.mrb[29].mxu0  ;;  %614 = vmatprep.mubr.bf16.mxu1 %v958_v47 }
 0x12f   :  { %v865_v53 = vadd.f32 %v864_v52, %v863_v51  ;;  %v866_v54 = vpop.f32.mrb[30].mxu0 }
 0x130   :  { %v867_v55 = vpop.f32.mrb[31].mxu0 }
 0x131   :  { %v868_v56 = vadd.f32 %v867_v55, %v866_v54 }
 0x133   :  { %v407_v57 = vpack.c.bf16 %v868_v56, %v865_v53 }
 0x135   :  { %v869_v58 = vpop.f32.mrb[32].mxu0  ;;  %615 = vmatmul.mubr.bf16.gmra.mrb[28].mxu1 %v407_v57 }
 0x136   :  { %v870_v59 = vpop.f32.mrb[33].mxu0  ;;  %624 = vmatprep.mubr.bf16.mxu1 %v958_v47 }
 0x137   :  { %v871_v60 = vadd.f32 %v870_v59, %v869_v58  ;;  %v872_v61 = vpop.f32.mrb[34].mxu0 }
 0x138   :  { %v873_v62 = vpop.f32.mrb[35].mxu0 }
 0x139   :  { %v874_v63 = vadd.f32 %v873_v62, %v872_v61 }
 0x13b   :  { %v408_v0 = vpack.c.bf16 %v874_v63, %v871_v60 }
 0x13d   :  { %v875_v1 = vpop.f32.mrb[36].mxu0  ;;  %625 = vmatmul.mubr.bf16.gmra.mrb[32].mxu1 %v408_v0 }
 0x13e   :  { %v876_v2 = vpop.f32.mrb[37].mxu0  ;;  %634 = vmatprep.mubr.bf16.mxu1 %v958_v47 }
 0x13f   :  { %v877_v3 = vadd.f32 %v876_v2, %v875_v1  ;;  %v878_v4 = vpop.f32.mrb[38].mxu0 }
 0x140   :  { %v879_v5 = vpop.f32.mrb[39].mxu0 }
 0x141   :  { %v880_v6 = vadd.f32 %v879_v5, %v878_v4 }
 0x143   :  { %v409_v7 = vpack.c.bf16 %v880_v6, %v877_v3 }
 0x145   :  { %v881_v8 = vpop.f32.mrb[40].mxu0  ;;  %635 = vmatmul.mubr.bf16.gmra.mrb[36].mxu1 %v409_v7 }
 0x146   :  { %v882_v9 = vpop.f32.mrb[41].mxu0  ;;  %644 = vmatprep.mubr.bf16.mxu1 %v958_v47 }
 0x147   :  { %v883_v10 = vadd.f32 %v882_v9, %v881_v8  ;;  %v884_v11 = vpop.f32.mrb[42].mxu0 }
 0x148   :  { %v885_v12 = vpop.f32.mrb[43].mxu0 }
 0x149   :  { %v886_v13 = vadd.f32 %v885_v12, %v884_v11 }
 0x14b   :  { %v410_v14 = vpack.c.bf16 %v886_v13, %v883_v10 }
 0x14d   :  { %v887_v15 = vpop.f32.mrb[44].mxu0  ;;  %645 = vmatmul.mubr.bf16.gmra.mrb[40].mxu1 %v410_v14 }
 0x14e   :  { %v888_v16 = vpop.f32.mrb[45].mxu0  ;;  %654 = vmatprep.mubr.bf16.mxu1 %v958_v47 }
 0x14f   :  { %v889_v17 = vadd.f32 %v888_v16, %v887_v15  ;;  %v890_v18 = vpop.f32.mrb[46].mxu0 }
 0x150   :  { %v891_v19 = vpop.f32.mrb[47].mxu0 }
 0x151   :  { %v892_v20 = vadd.f32 %v891_v19, %v890_v18 }
 0x153   :  { %v411_v21 = vpack.c.bf16 %v892_v20, %v889_v17 }
 0x155   :  { %v893_v22 = vpop.f32.mrb[48].mxu0  ;;  %655 = vmatmul.mubr.bf16.gmra.mrb[44].mxu1 %v411_v21 }
 0x156   :  { %v894_v23 = vpop.f32.mrb[49].mxu0  ;;  %664 = vmatprep.mubr.bf16.mxu1 %v958_v47 }
 0x157   :  { %v895_v24 = vadd.f32 %v894_v23, %v893_v22  ;;  %v896_v25 = vpop.f32.mrb[50].mxu0 }
 0x158   :  { %v897_v26 = vpop.f32.mrb[51].mxu0 }
 0x159   :  { %v898_v27 = vadd.f32 %v897_v26, %v896_v25 }
 0x15b   :  { %v412_v28 = vpack.c.bf16 %v898_v27, %v895_v24 }
 0x15d   :  { %v899_v29 = vpop.f32.mrb[52].mxu0  ;;  %665 = vmatmul.mubr.bf16.gmra.mrb[48].mxu1 %v412_v28 }
 0x15e   :  { %v900_v30 = vpop.f32.mrb[53].mxu0  ;;  %674 = vmatprep.mubr.bf16.mxu1 %v958_v47 }
 0x15f   :  { %v901_v31 = vadd.f32 %v900_v30, %v899_v29  ;;  %v902_v32 = vpop.f32.mrb[54].mxu0 }
 0x160   :  { %v903_v33 = vpop.f32.mrb[55].mxu0 }
 0x161   :  { %v904_v34 = vadd.f32 %v903_v33, %v902_v32 }
 0x163   :  { %v413_v35 = vpack.c.bf16 %v904_v34, %v901_v31 }
 0x165   :  { %v905_v36 = vpop.f32.mrb[56].mxu0  ;;  %675 = vmatmul.mubr.bf16.gmra.mrb[52].mxu1 %v413_v35 }
 0x166   :  { %v906_v37 = vpop.f32.mrb[57].mxu0  ;;  %684 = vmatprep.mubr.bf16.mxu1 %v958_v47 }
 0x167   :  { %v907_v38 = vadd.f32 %v906_v37, %v905_v36  ;;  %v908_v39 = vpop.f32.mrb[58].mxu0 }
 0x168   :  { %v909_v40 = vpop.f32.mrb[59].mxu0 }
 0x169   :  { %v910_v41 = vadd.f32 %v909_v40, %v908_v39 }
 0x16b   :  { %v414_v42 = vpack.c.bf16 %v910_v41, %v907_v38 }
 0x16d   :  { %v911_v43 = vpop.f32.mrb[60].mxu0  ;;  %685 = vmatmul.mubr.bf16.gmra.mrb[56].mxu1 %v414_v42 }
 0x16e   :  { %v912_v44 = vpop.f32.mrb[61].mxu0  ;;  %694 = vmatprep.mubr.bf16.mxu1 %v958_v47 }
 0x16f   :  { %v913_v45 = vadd.f32 %v912_v44, %v911_v43  ;;  %v914_v46 = vpop.f32.mrb[62].mxu0 }
 0x170   :  { %v915_v48 = vpop.f32.mrb[63].mxu0 }
 0x171   :  { %v916_v49 = vadd.f32 %v915_v48, %v914_v46 }
 0x173   :  { %v415_v50 = vpack.c.bf16 %v916_v49, %v913_v45 }
 0x175   :  { %695 = vmatmul.mubr.bf16.gmra.mrb[60].mxu1 %v415_v50 }
 0x1d0   :  { %v546_v51 = vpop.f32.mrb[0].mxu1 }
 0x1d1   :  { %705 = vst [vmem:[%s1478_s3] sm:$0xff] %v546_v51  ;;  %v548_v52 = vpop.f32.mrb[1].mxu1 }
 0x1d2   :  { %706 = vst [vmem:[%s1478_s3 + $0x8] sm:$0xff] %v548_v52  ;;  %v550_v53 = vpop.f32.mrb[2].mxu1 }
 0x1d3   :  { %707 = vst [vmem:[%s1478_s3 + $0x10] sm:$0xff] %v550_v53  ;;  %v552_v47 = vpop.f32.mrb[3].mxu1 }
 0x1d4   :  { %708 = vst [vmem:[%s1478_s3 + $0x18] sm:$0xff] %v552_v47 }
 0x1d8   :  { %v556_v54 = vpop.f32.mrb[4].mxu1 }
 0x1d9   :  { %709 = vst [vmem:[%s1478_s3 + $0x20] sm:$0xff] %v556_v54  ;;  %v558_v55 = vpop.f32.mrb[5].mxu1 }
 0x1da   :  { %710 = vst [vmem:[%s1478_s3 + $0x28] sm:$0xff] %v558_v55  ;;  %v560_v56 = vpop.f32.mrb[6].mxu1 }
 0x1db   :  { %711 = vst [vmem:[%s1478_s3 + $0x30] sm:$0xff] %v560_v56  ;;  %v562_v57 = vpop.f32.mrb[7].mxu1 }
 0x1dc   :  { %712 = vst [vmem:[%s1478_s3 + $0x38] sm:$0xff] %v562_v57 }
 0x1e0   :  { %v566_v58 = vpop.f32.mrb[8].mxu1 }
 0x1e1   :  { %713 = vst [vmem:[%s1478_s3 + $0x40] sm:$0xff] %v566_v58  ;;  %v568_v59 = vpop.f32.mrb[9].mxu1 }
 0x1e2   :  { %714 = vst [vmem:[%s1478_s3 + $0x48] sm:$0xff] %v568_v59  ;;  %v570_v60 = vpop.f32.mrb[10].mxu1 }
 0x1e3   :  { %715 = vst [vmem:[%s1478_s3 + $0x50] sm:$0xff] %v570_v60  ;;  %v572_v61 = vpop.f32.mrb[11].mxu1 }
 0x1e4   :  { %716 = vst [vmem:[%s1478_s3 + $0x58] sm:$0xff] %v572_v61 }
 0x1e8   :  { %v576_v62 = vpop.f32.mrb[12].mxu1 }
 0x1e9   :  { %717 = vst [vmem:[%s1478_s3 + $0x60] sm:$0xff] %v576_v62  ;;  %v578_v63 = vpop.f32.mrb[13].mxu1 }
 0x1ea   :  { %718 = vst [vmem:[%s1478_s3 + $0x68] sm:$0xff] %v578_v63  ;;  %v580_v0 = vpop.f32.mrb[14].mxu1 }
 0x1eb   :  { %719 = vst [vmem:[%s1478_s3 + $0x70] sm:$0xff] %v580_v0  ;;  %v582_v1 = vpop.f32.mrb[15].mxu1 }
 0x1ec   :  { %720 = vst [vmem:[%s1478_s3 + $0x78] sm:$0xff] %v582_v1 }
 0x1f0   :  { %v586_v2 = vpop.f32.mrb[16].mxu1 }
 0x1f1   :  { %721 = vst [vmem:[%s1478_s3 + $0x80] sm:$0xff] %v586_v2  ;;  %v588_v3 = vpop.f32.mrb[17].mxu1 }
 0x1f2   :  { %722 = vst [vmem:[%s1478_s3 + $0x88] sm:$0xff] %v588_v3  ;;  %v590_v4 = vpop.f32.mrb[18].mxu1 }
 0x1f3   :  { %723 = vst [vmem:[%s1478_s3 + $0x90] sm:$0xff] %v590_v4  ;;  %v592_v5 = vpop.f32.mrb[19].mxu1 }
 0x1f4   :  { %724 = vst [vmem:[%s1478_s3 + $0x98] sm:$0xff] %v592_v5 }
 0x1f8   :  { %v596_v6 = vpop.f32.mrb[20].mxu1 }
 0x1f9   :  { %725 = vst [vmem:[%s1478_s3 + $0xa0] sm:$0xff] %v596_v6  ;;  %v598_v7 = vpop.f32.mrb[21].mxu1 }
 0x1fa   :  { %726 = vst [vmem:[%s1478_s3 + $0xa8] sm:$0xff] %v598_v7  ;;  %v600_v8 = vpop.f32.mrb[22].mxu1 }
 0x1fb   :  { %727 = vst [vmem:[%s1478_s3 + $0xb0] sm:$0xff] %v600_v8  ;;  %v602_v9 = vpop.f32.mrb[23].mxu1 }
 0x1fc   :  { %728 = vst [vmem:[%s1478_s3 + $0xb8] sm:$0xff] %v602_v9 }
 0x200   :  { %v606_v10 = vpop.f32.mrb[24].mxu1 }
 0x201   :  { %729 = vst [vmem:[%s1478_s3 + $0xc0] sm:$0xff] %v606_v10  ;;  %v608_v11 = vpop.f32.mrb[25].mxu1 }
 0x202   :  { %730 = vst [vmem:[%s1478_s3 + $0xc8] sm:$0xff] %v608_v11  ;;  %v610_v12 = vpop.f32.mrb[26].mxu1 }
 0x203   :  { %731 = vst [vmem:[%s1478_s3 + $0xd0] sm:$0xff] %v610_v12  ;;  %v612_v13 = vpop.f32.mrb[27].mxu1 }
 0x204   :  { %732 = vst [vmem:[%s1478_s3 + $0xd8] sm:$0xff] %v612_v13 }
 0x208   :  { %v616_v14 = vpop.f32.mrb[28].mxu1 }
 0x209   :  { %733 = vst [vmem:[%s1478_s3 + $0xe0] sm:$0xff] %v616_v14  ;;  %v618_v15 = vpop.f32.mrb[29].mxu1 }
 0x20a   :  { %734 = vst [vmem:[%s1478_s3 + $0xe8] sm:$0xff] %v618_v15  ;;  %v620_v16 = vpop.f32.mrb[30].mxu1 }
 0x20b   :  { %735 = vst [vmem:[%s1478_s3 + $0xf0] sm:$0xff] %v620_v16  ;;  %v622_v17 = vpop.f32.mrb[31].mxu1 }
 0x20c   :  { %736 = vst [vmem:[%s1478_s3 + $0xf8] sm:$0xff] %v622_v17 }
 0x210   :  { %v626_v18 = vpop.f32.mrb[32].mxu1 }
 0x211   :  { %737 = vst [vmem:[%s1478_s3 + $0x100] sm:$0xff] %v626_v18  ;;  %v628_v19 = vpop.f32.mrb[33].mxu1 }
 0x212   :  { %738 = vst [vmem:[%s1478_s3 + $0x108] sm:$0xff] %v628_v19  ;;  %v630_v20 = vpop.f32.mrb[34].mxu1 }
 0x213   :  { %739 = vst [vmem:[%s1478_s3 + $0x110] sm:$0xff] %v630_v20  ;;  %v632_v21 = vpop.f32.mrb[35].mxu1 }
 0x214   :  { %740 = vst [vmem:[%s1478_s3 + $0x118] sm:$0xff] %v632_v21 }
 0x218   :  { %v636_v22 = vpop.f32.mrb[36].mxu1 }
 0x219   :  { %741 = vst [vmem:[%s1478_s3 + $0x120] sm:$0xff] %v636_v22  ;;  %v638_v23 = vpop.f32.mrb[37].mxu1 }
 0x21a   :  { %742 = vst [vmem:[%s1478_s3 + $0x128] sm:$0xff] %v638_v23  ;;  %v640_v24 = vpop.f32.mrb[38].mxu1 }
 0x21b   :  { %743 = vst [vmem:[%s1478_s3 + $0x130] sm:$0xff] %v640_v24  ;;  %v642_v25 = vpop.f32.mrb[39].mxu1 }
 0x21c   :  { %744 = vst [vmem:[%s1478_s3 + $0x138] sm:$0xff] %v642_v25 }
 0x220   :  { %v646_v26 = vpop.f32.mrb[40].mxu1 }
 0x221   :  { %745 = vst [vmem:[%s1478_s3 + $0x140] sm:$0xff] %v646_v26  ;;  %v648_v27 = vpop.f32.mrb[41].mxu1 }
 0x222   :  { %746 = vst [vmem:[%s1478_s3 + $0x148] sm:$0xff] %v648_v27  ;;  %v650_v28 = vpop.f32.mrb[42].mxu1 }
 0x223   :  { %747 = vst [vmem:[%s1478_s3 + $0x150] sm:$0xff] %v650_v28  ;;  %v652_v29 = vpop.f32.mrb[43].mxu1 }
 0x224   :  { %748 = vst [vmem:[%s1478_s3 + $0x158] sm:$0xff] %v652_v29 }
 0x228   :  { %v656_v30 = vpop.f32.mrb[44].mxu1 }
 0x229   :  { %749 = vst [vmem:[%s1478_s3 + $0x160] sm:$0xff] %v656_v30  ;;  %v658_v31 = vpop.f32.mrb[45].mxu1 }
 0x22a   :  { %750 = vst [vmem:[%s1478_s3 + $0x168] sm:$0xff] %v658_v31  ;;  %v660_v32 = vpop.f32.mrb[46].mxu1 }
 0x22b   :  { %751 = vst [vmem:[%s1478_s3 + $0x170] sm:$0xff] %v660_v32  ;;  %v662_v33 = vpop.f32.mrb[47].mxu1 }
 0x22c   :  { %752 = vst [vmem:[%s1478_s3 + $0x178] sm:$0xff] %v662_v33 }
 0x230   :  { %v666_v34 = vpop.f32.mrb[48].mxu1 }
 0x231   :  { %753 = vst [vmem:[%s1478_s3 + $0x180] sm:$0xff] %v666_v34  ;;  %v668_v35 = vpop.f32.mrb[49].mxu1 }
 0x232   :  { %754 = vst [vmem:[%s1478_s3 + $0x188] sm:$0xff] %v668_v35  ;;  %v670_v36 = vpop.f32.mrb[50].mxu1 }
 0x233   :  { %755 = vst [vmem:[%s1478_s3 + $0x190] sm:$0xff] %v670_v36  ;;  %v672_v37 = vpop.f32.mrb[51].mxu1 }
 0x234   :  { %756 = vst [vmem:[%s1478_s3 + $0x198] sm:$0xff] %v672_v37 }
 0x238   :  { %v676_v38 = vpop.f32.mrb[52].mxu1 }
 0x239   :  { %757 = vst [vmem:[%s1478_s3 + $0x1a0] sm:$0xff] %v676_v38  ;;  %v678_v39 = vpop.f32.mrb[53].mxu1 }
 0x23a   :  { %758 = vst [vmem:[%s1478_s3 + $0x1a8] sm:$0xff] %v678_v39  ;;  %v680_v40 = vpop.f32.mrb[54].mxu1 }
 0x23b   :  { %759 = vst [vmem:[%s1478_s3 + $0x1b0] sm:$0xff] %v680_v40  ;;  %v682_v41 = vpop.f32.mrb[55].mxu1 }
 0x23c   :  { %760 = vst [vmem:[%s1478_s3 + $0x1b8] sm:$0xff] %v682_v41 }
 0x240   :  { %v686_v42 = vpop.f32.mrb[56].mxu1 }
 0x241   :  { %761 = vst [vmem:[%s1478_s3 + $0x1c0] sm:$0xff] %v686_v42  ;;  %v688_v43 = vpop.f32.mrb[57].mxu1 }
 0x242   :  { %762 = vst [vmem:[%s1478_s3 + $0x1c8] sm:$0xff] %v688_v43  ;;  %v690_v44 = vpop.f32.mrb[58].mxu1 }
 0x243   :  { %763 = vst [vmem:[%s1478_s3 + $0x1d0] sm:$0xff] %v690_v44  ;;  %v692_v45 = vpop.f32.mrb[59].mxu1 }
 0x244   :  { %764 = vst [vmem:[%s1478_s3 + $0x1d8] sm:$0xff] %v692_v45 }
 0x248   :  { %v696_v46 = vpop.f32.mrb[60].mxu1 }
 0x249   :  { %765 = vst [vmem:[%s1478_s3 + $0x1e0] sm:$0xff] %v696_v46  ;;  %v698_v48 = vpop.f32.mrb[61].mxu1 }
 0x24a   :  { %766 = vst [vmem:[%s1478_s3 + $0x1e8] sm:$0xff] %v698_v48  ;;  %v700_v49 = vpop.f32.mrb[62].mxu1 }
 0x24b   :  { %767 = vst [vmem:[%s1478_s3 + $0x1f0] sm:$0xff] %v700_v49  ;;  %v702_v50 = vpop.f32.mrb[63].mxu1 }
 0x24c   :  { %768 = vst [vmem:[%s1478_s3 + $0x1f8] sm:$0xff] %v702_v50 }

// kernel: vgae_forward.7
= control target key start
LH: loop header
LB: loop body
LE: loop exit
PB: predicated region body
PF: predicated region fallthrough
CT: control target
= control target key end

     0   :  { %v626_v2 = vmov 0   ;;  %s769_s0 = inlined_call_operand.vmem [shape: bf16[256,128], index: 0, kind: input, shape index: {}]   ;;  %s770_s1 = inlined_call_operand.vmem [shape: bf16[128,256], index: 1, kind: input, shape index: {}]   ;;  %s771_s2 = inlined_call_operand.hbm [shape: f32[256,256], index: 2, kind: output, shape index: {}]  }
   0x1   :  { %v562_v0 = vld [vmem:[%s770_s1 + $0x4] ss:$8 sps:$4 sm:$0xff]   ;;  %v564_v1 = vld [vmem:[%s770_s1] ss:$8 sps:$4 sm:$0xff]   ;;  %269 = vmatprep.mubr.bf16.mxu0 %v626_v2  ;;  %349 = vmatprep.mubr.bf16.mxu1 %v626_v2  ;;  %v565_v3 = vld [vmem:[%s770_s1 + $0x14] ss:$8 sps:$4 sm:$0xff]  }
   0x2   :  { %237 = vmatprep.subr.bf16.mxu0 %v562_v0  ;;  %542 = vmatprep.subr.bf16.mxu1 %v562_v0  ;;  %v567_v4 = vld [vmem:[%s770_s1 + $0x10] ss:$8 sps:$4 sm:$0xff]   ;;  %v568_v5 = vld [vmem:[%s770_s1 + $0x24] ss:$8 sps:$4 sm:$0xff]   ;;  %v570_v6 = vld [vmem:[%s770_s1 + $0x20] ss:$8 sps:$4 sm:$0xff]  }
   0x3   :  { %238 = vmatpush1.bf16.msra.mxu0 %v564_v1  ;;  %550 = vmatpush1.bf16.msra.mxu1 %v564_v1  ;;  %v571_v7 = vld [vmem:[%s770_s1 + $0x34] ss:$8 sps:$4 sm:$0xff]   ;;  %v573_v8 = vld [vmem:[%s770_s1 + $0x30] ss:$8 sps:$4 sm:$0xff]   ;;  %v574_v9 = vld [vmem:[%s770_s1 + $0x44] ss:$8 sps:$4 sm:$0xff]  }
   0x4   :  { %239 = vmatprep.subr.bf16.mxu0 %v565_v3  ;;  %543 = vmatprep.subr.bf16.mxu1 %v565_v3  ;;  %v576_v10 = vld [vmem:[%s770_s1 + $0x40] ss:$8 sps:$4 sm:$0xff]   ;;  %v577_v11 = vld [vmem:[%s770_s1 + $0x54] ss:$8 sps:$4 sm:$0xff]   ;;  %v579_v12 = vld [vmem:[%s770_s1 + $0x50] ss:$8 sps:$4 sm:$0xff]  }
   0x5   :  { %v580_v13 = vld [vmem:[%s770_s1 + $0x64] ss:$8 sps:$4 sm:$0xff]   ;;  %v582_v14 = vld [vmem:[%s770_s1 + $0x60] ss:$8 sps:$4 sm:$0xff]   ;;  %v583_v15 = vld [vmem:[%s770_s1 + $0x74] ss:$8 sps:$4 sm:$0xff]  }
   0x7   :  { %240 = vmatpush1.bf16.msra.mxu0 %v567_v4  ;;  %551 = vmatpush1.bf16.msra.mxu1 %v567_v4 }
   0x8   :  { %241 = vmatprep.subr.bf16.mxu0 %v568_v5  ;;  %544 = vmatprep.subr.bf16.mxu1 %v568_v5 }
   0xb   :  { %242 = vmatpush1.bf16.msra.mxu0 %v570_v6  ;;  %552 = vmatpush1.bf16.msra.mxu1 %v570_v6 }
   0xc   :  { %243 = vmatprep.subr.bf16.mxu0 %v571_v7  ;;  %545 = vmatprep.subr.bf16.mxu1 %v571_v7 }
   0xf   :  { %244 = vmatpush1.bf16.msra.mxu0 %v573_v8  ;;  %553 = vmatpush1.bf16.msra.mxu1 %v573_v8 }
  0x10   :  { %245 = vmatprep.subr.bf16.mxu0 %v574_v9  ;;  %546 = vmatprep.subr.bf16.mxu1 %v574_v9 }
  0x13   :  { %246 = vmatpush1.bf16.msra.mxu0 %v576_v10  ;;  %554 = vmatpush1.bf16.msra.mxu1 %v576_v10 }
  0x14   :  { %247 = vmatprep.subr.bf16.mxu0 %v577_v11  ;;  %547 = vmatprep.subr.bf16.mxu1 %v577_v11 }
  0x17   :  { %248 = vmatpush1.bf16.msra.mxu0 %v579_v12  ;;  %555 = vmatpush1.bf16.msra.mxu1 %v579_v12 }
  0x18   :  { %249 = vmatprep.subr.bf16.mxu0 %v580_v13  ;;  %548 = vmatprep.subr.bf16.mxu1 %v580_v13 }
  0x19   :  { %7 = vsyncpa [#allocation3], 0  ;;  %v585_v16 = vld [vmem:[%s770_s1 + $0x70] ss:$8 sps:$4 sm:$0xff]   ;;  %v586_v17 = vld [vmem:[%s769_s0] sm:$0xff]  }
  0x1a   :  { %v587_v18 = vld [vmem:[%s769_s0 + $0x40] sm:$0xff]   ;;  %v588_v19 = vld [vmem:[%s769_s0 + $0x8] sm:$0xff]   ;;  %v590_v21 = vld [vmem:[%s769_s0 + $0x10] sm:$0xff]  }
  0x1b   :  { %250 = vmatpush1.bf16.msra.mxu0 %v582_v14  ;;  %556 = vmatpush1.bf16.msra.mxu1 %v582_v14  ;;  %v589_v20 = vld [vmem:[%s769_s0 + $0x48] sm:$0xff]   ;;  %v591_v22 = vld [vmem:[%s769_s0 + $0x50] sm:$0xff]   ;;  %v592_v23 = vld [vmem:[%s769_s0 + $0x18] sm:$0xff]  }
  0x1c   :  { %251 = vmatprep.subr.bf16.mxu0 %v583_v15  ;;  %549 = vmatprep.subr.bf16.mxu1 %v583_v15  ;;  %v593_v24 = vld [vmem:[%s769_s0 + $0x58] sm:$0xff]   ;;  %v594_v25 = vld [vmem:[%s769_s0 + $0x20] sm:$0xff]   ;;  %v596_v27 = vld [vmem:[%s769_s0 + $0x28] sm:$0xff]  }
  0x1d   :  { %v595_v26 = vld [vmem:[%s769_s0 + $0x60] sm:$0xff]   ;;  %v597_v28 = vld [vmem:[%s769_s0 + $0x68] sm:$0xff]   ;;  %v598_v29 = vld [vmem:[%s769_s0 + $0x30] sm:$0xff]  }
  0x1e   :  { %v599_v30 = vld [vmem:[%s769_s0 + $0x70] sm:$0xff]   ;;  %v600_v31 = vld [vmem:[%s769_s0 + $0x38] sm:$0xff]  }
  0x1f   :  { %252 = vmatpush1.bf16.msra.mxu0 %v585_v16  ;;  %557 = vmatpush1.bf16.msra.mxu1 %v585_v16  ;;  %v601_v32 = vld [vmem:[%s769_s0 + $0x78] sm:$0xff]   ;;  %s627_s0 = smov [#allocation2]  }
  0x20   :  { %s499_s16 = sshll.u32 %s627_s0, 4  ;;  %s500_s16 = int_to_ptr.vmem [resolvable:$true] %s499_s16 }
  0x21   :  { %s602_s17 = scalar_lea.vmem %s500_s16, 8192  ;;  %p607_p1 = scmp.lt.s32.totalorder %s500_s16, %s500_s16 }
  0x22   :  { %270 = vmatmul.mubr.bf16.vlgmr.msra.gmra.mrb[0].mxu0 %v586_v17  ;;  %350 = vmatmul.mubr.bf16.vlgmr.msra.gmra.mrb[0].mxu1 %v587_v18  ;;  %p603_p0 = scmp.ne.s32.totalorder %s500_s16, %s602_s17  ;;  %p608_p2 = scmp.lt.s32.totalorder %s602_s17, %s602_s17 }
  0x23   :  { %279 = vmatprep.mubr.bf16.mxu0 %v626_v2  ;;  %359 = vmatprep.mubr.bf16.mxu1 %v626_v2 }
  0x24   :  { %p609_p3 = por %p608_p2, %p607_p1 }
  0x26   :  { %p610_p4 = pnand %p609_p3, %p603_p0 }
  0x2a   :  { %280 = vmatmul.mubr.bf16.gmra.mrb[4].mxu0 %v588_v19  ;;  %360 = vmatmul.mubr.bf16.gmra.mrb[4].mxu1 %v589_v20 }
  0x2b   :  { %289 = vmatprep.mubr.bf16.mxu0 %v626_v2  ;;  %369 = vmatprep.mubr.bf16.mxu1 %v626_v2 }
  0x32   :  { %290 = vmatmul.mubr.bf16.gmra.mrb[8].mxu0 %v590_v21  ;;  %370 = vmatmul.mubr.bf16.gmra.mrb[8].mxu1 %v591_v22 }
  0x33   :  { %299 = vmatprep.mubr.bf16.mxu0 %v626_v2  ;;  %379 = vmatprep.mubr.bf16.mxu1 %v626_v2 }
  0x3a   :  { %300 = vmatmul.mubr.bf16.gmra.mrb[12].mxu0 %v592_v23  ;;  %380 = vmatmul.mubr.bf16.gmra.mrb[12].mxu1 %v593_v24 }
  0x3b   :  { %309 = vmatprep.mubr.bf16.mxu0 %v626_v2  ;;  %389 = vmatprep.mubr.bf16.mxu1 %v626_v2 }
  0x42   :  { %310 = vmatmul.mubr.bf16.gmra.mrb[16].mxu0 %v594_v25  ;;  %390 = vmatmul.mubr.bf16.gmra.mrb[16].mxu1 %v595_v26 }
  0x43   :  { %319 = vmatprep.mubr.bf16.mxu0 %v626_v2  ;;  %399 = vmatprep.mubr.bf16.mxu1 %v626_v2 }
  0x4a   :  { %320 = vmatmul.mubr.bf16.gmra.mrb[20].mxu0 %v596_v27  ;;  %400 = vmatmul.mubr.bf16.gmra.mrb[20].mxu1 %v597_v28 }
  0x4b   :  { %329 = vmatprep.mubr.bf16.mxu0 %v626_v2  ;;  %409 = vmatprep.mubr.bf16.mxu1 %v626_v2 }
  0x52   :  { %330 = vmatmul.mubr.bf16.gmra.mrb[24].mxu0 %v598_v29  ;;  %410 = vmatmul.mubr.bf16.gmra.mrb[24].mxu1 %v599_v30 }
  0x53   :  { %339 = vmatprep.mubr.bf16.mxu0 %v626_v2  ;;  %419 = vmatprep.mubr.bf16.mxu1 %v626_v2 }
  0x5a   :  { %340 = vmatmul.mubr.bf16.gmra.mrb[28].mxu0 %v600_v31  ;;  %420 = vmatmul.mubr.bf16.gmra.mrb[28].mxu1 %v601_v32 }
  0xf5   :  { %v271_v33 = vpop.f32.mrb[0].mxu0  ;;  %v351_v34 = vpop.f32.mrb[0].mxu1 }
  0xf6   :  { %430 = vst [vmem:[#allocation2] sm:$0xff] %v271_v33  ;;  %462 = vst [vmem:[#allocation2 + $0x100] sm:$0xff] %v351_v34  ;;  %v273_v35 = vpop.f32.mrb[1].mxu0  ;;  %v353_v36 = vpop.f32.mrb[1].mxu1 }
  0xf7   :  { %431 = vst [vmem:[#allocation2 + $0x8] sm:$0xff] %v273_v35  ;;  %463 = vst [vmem:[#allocation2 + $0x108] sm:$0xff] %v353_v36  ;;  %v275_v37 = vpop.f32.mrb[2].mxu0  ;;  %v355_v38 = vpop.f32.mrb[2].mxu1 }
  0xf8   :  { %432 = vst [vmem:[#allocation2 + $0x10] sm:$0xff] %v275_v37  ;;  %464 = vst [vmem:[#allocation2 + $0x110] sm:$0xff] %v355_v38  ;;  %v277_v39 = vpop.f32.mrb[3].mxu0  ;;  %v357_v40 = vpop.f32.mrb[3].mxu1 }
  0xf9   :  { %433 = vst [vmem:[#allocation2 + $0x18] sm:$0xff] %v277_v39  ;;  %465 = vst [vmem:[#allocation2 + $0x118] sm:$0xff] %v357_v40 }
  0xfd   :  { %v281_v41 = vpop.f32.mrb[4].mxu0  ;;  %v361_v42 = vpop.f32.mrb[4].mxu1 }
  0xfe   :  { %434 = vst [vmem:[#allocation2 + $0x20] sm:$0xff] %v281_v41  ;;  %466 = vst [vmem:[#allocation2 + $0x120] sm:$0xff] %v361_v42  ;;  %v283_v43 = vpop.f32.mrb[5].mxu0  ;;  %v363_v44 = vpop.f32.mrb[5].mxu1 }
  0xff   :  { %435 = vst [vmem:[#allocation2 + $0x28] sm:$0xff] %v283_v43  ;;  %467 = vst [vmem:[#allocation2 + $0x128] sm:$0xff] %v363_v44  ;;  %v285_v45 = vpop.f32.mrb[6].mxu0  ;;  %v365_v46 = vpop.f32.mrb[6].mxu1 }
 0x100   :  { %436 = vst [vmem:[#allocation2 + $0x30] sm:$0xff] %v285_v45  ;;  %468 = vst [vmem:[#allocation2 + $0x130] sm:$0xff] %v365_v46  ;;  %v287_v47 = vpop.f32.mrb[7].mxu0  ;;  %v367_v48 = vpop.f32.mrb[7].mxu1 }
 0x101   :  { %437 = vst [vmem:[#allocation2 + $0x38] sm:$0xff] %v287_v47  ;;  %469 = vst [vmem:[#allocation2 + $0x138] sm:$0xff] %v367_v48 }
 0x105   :  { %v291_v49 = vpop.f32.mrb[8].mxu0  ;;  %v371_v50 = vpop.f32.mrb[8].mxu1 }
 0x106   :  { %438 = vst [vmem:[#allocation2 + $0x40] sm:$0xff] %v291_v49  ;;  %470 = vst [vmem:[#allocation2 + $0x140] sm:$0xff] %v371_v50  ;;  %v293_v51 = vpop.f32.mrb[9].mxu0  ;;  %v373_v52 = vpop.f32.mrb[9].mxu1 }
 0x107   :  { %439 = vst [vmem:[#allocation2 + $0x48] sm:$0xff] %v293_v51  ;;  %471 = vst [vmem:[#allocation2 + $0x148] sm:$0xff] %v373_v52  ;;  %v295_v53 = vpop.f32.mrb[10].mxu0  ;;  %v375_v54 = vpop.f32.mrb[10].mxu1 }
 0x108   :  { %440 = vst [vmem:[#allocation2 + $0x50] sm:$0xff] %v295_v53  ;;  %472 = vst [vmem:[#allocation2 + $0x150] sm:$0xff] %v375_v54  ;;  %v297_v55 = vpop.f32.mrb[11].mxu0  ;;  %v377_v56 = vpop.f32.mrb[11].mxu1 }
 0x109   :  { %441 = vst [vmem:[#allocation2 + $0x58] sm:$0xff] %v297_v55  ;;  %473 = vst [vmem:[#allocation2 + $0x158] sm:$0xff] %v377_v56 }
 0x10d   :  { %v301_v57 = vpop.f32.mrb[12].mxu0  ;;  %v381_v58 = vpop.f32.mrb[12].mxu1 }
 0x10e   :  { %442 = vst [vmem:[#allocation2 + $0x60] sm:$0xff] %v301_v57  ;;  %474 = vst [vmem:[#allocation2 + $0x160] sm:$0xff] %v381_v58  ;;  %v303_v59 = vpop.f32.mrb[13].mxu0  ;;  %v383_v60 = vpop.f32.mrb[13].mxu1 }
 0x10f   :  { %443 = vst [vmem:[#allocation2 + $0x68] sm:$0xff] %v303_v59  ;;  %475 = vst [vmem:[#allocation2 + $0x168] sm:$0xff] %v383_v60  ;;  %v305_v61 = vpop.f32.mrb[14].mxu0  ;;  %v385_v62 = vpop.f32.mrb[14].mxu1 }
 0x110   :  { %444 = vst [vmem:[#allocation2 + $0x70] sm:$0xff] %v305_v61  ;;  %476 = vst [vmem:[#allocation2 + $0x170] sm:$0xff] %v385_v62  ;;  %v307_v63 = vpop.f32.mrb[15].mxu0  ;;  %v387_v0 = vpop.f32.mrb[15].mxu1 }
 0x111   :  { %445 = vst [vmem:[#allocation2 + $0x78] sm:$0xff] %v307_v63  ;;  %477 = vst [vmem:[#allocation2 + $0x178] sm:$0xff] %v387_v0 }
 0x115   :  { %v311_v1 = vpop.f32.mrb[16].mxu0  ;;  %v391_v2 = vpop.f32.mrb[16].mxu1 }
 0x116   :  { %446 = vst [vmem:[#allocation2 + $0x80] sm:$0xff] %v311_v1  ;;  %478 = vst [vmem:[#allocation2 + $0x180] sm:$0xff] %v391_v2  ;;  %v313_v3 = vpop.f32.mrb[17].mxu0  ;;  %v393_v4 = vpop.f32.mrb[17].mxu1 }
 0x117   :  { %447 = vst [vmem:[#allocation2 + $0x88] sm:$0xff] %v313_v3  ;;  %479 = vst [vmem:[#allocation2 + $0x188] sm:$0xff] %v393_v4  ;;  %v315_v5 = vpop.f32.mrb[18].mxu0  ;;  %v395_v6 = vpop.f32.mrb[18].mxu1 }
 0x118   :  { %448 = vst [vmem:[#allocation2 + $0x90] sm:$0xff] %v315_v5  ;;  %480 = vst [vmem:[#allocation2 + $0x190] sm:$0xff] %v395_v6  ;;  %v317_v7 = vpop.f32.mrb[19].mxu0  ;;  %v397_v8 = vpop.f32.mrb[19].mxu1 }
 0x119   :  { %449 = vst [vmem:[#allocation2 + $0x98] sm:$0xff] %v317_v7  ;;  %481 = vst [vmem:[#allocation2 + $0x198] sm:$0xff] %v397_v8 }
 0x11d   :  { %v321_v9 = vpop.f32.mrb[20].mxu0  ;;  %v401_v10 = vpop.f32.mrb[20].mxu1 }
 0x11e   :  { %450 = vst [vmem:[#allocation2 + $0xa0] sm:$0xff] %v321_v9  ;;  %482 = vst [vmem:[#allocation2 + $0x1a0] sm:$0xff] %v401_v10  ;;  %v323_v11 = vpop.f32.mrb[21].mxu0  ;;  %v403_v12 = vpop.f32.mrb[21].mxu1 }
 0x11f   :  { %451 = vst [vmem:[#allocation2 + $0xa8] sm:$0xff] %v323_v11  ;;  %483 = vst [vmem:[#allocation2 + $0x1a8] sm:$0xff] %v403_v12  ;;  %v325_v13 = vpop.f32.mrb[22].mxu0  ;;  %v405_v14 = vpop.f32.mrb[22].mxu1 }
 0x120   :  { %452 = vst [vmem:[#allocation2 + $0xb0] sm:$0xff] %v325_v13  ;;  %484 = vst [vmem:[#allocation2 + $0x1b0] sm:$0xff] %v405_v14  ;;  %v327_v15 = vpop.f32.mrb[23].mxu0  ;;  %v407_v16 = vpop.f32.mrb[23].mxu1 }
 0x121   :  { %453 = vst [vmem:[#allocation2 + $0xb8] sm:$0xff] %v327_v15  ;;  %485 = vst [vmem:[#allocation2 + $0x1b8] sm:$0xff] %v407_v16 }
 0x125   :  { %v331_v17 = vpop.f32.mrb[24].mxu0  ;;  %v411_v18 = vpop.f32.mrb[24].mxu1 }
 0x126   :  { %454 = vst [vmem:[#allocation2 + $0xc0] sm:$0xff] %v331_v17  ;;  %486 = vst [vmem:[#allocation2 + $0x1c0] sm:$0xff] %v411_v18  ;;  %v333_v19 = vpop.f32.mrb[25].mxu0  ;;  %v413_v20 = vpop.f32.mrb[25].mxu1 }
 0x127   :  { %455 = vst [vmem:[#allocation2 + $0xc8] sm:$0xff] %v333_v19  ;;  %487 = vst [vmem:[#allocation2 + $0x1c8] sm:$0xff] %v413_v20  ;;  %v335_v21 = vpop.f32.mrb[26].mxu0  ;;  %v415_v22 = vpop.f32.mrb[26].mxu1 }
 0x128   :  { %456 = vst [vmem:[#allocation2 + $0xd0] sm:$0xff] %v335_v21  ;;  %488 = vst [vmem:[#allocation2 + $0x1d0] sm:$0xff] %v415_v22  ;;  %v337_v23 = vpop.f32.mrb[27].mxu0  ;;  %v417_v24 = vpop.f32.mrb[27].mxu1 }
 0x129   :  { %457 = vst [vmem:[#allocation2 + $0xd8] sm:$0xff] %v337_v23  ;;  %489 = vst [vmem:[#allocation2 + $0x1d8] sm:$0xff] %v417_v24 }
 0x12d   :  { %v341_v25 = vpop.f32.mrb[28].mxu0  ;;  %v421_v26 = vpop.f32.mrb[28].mxu1 }
 0x12e   :  { %458 = vst [vmem:[#allocation2 + $0xe0] sm:$0xff] %v341_v25  ;;  %490 = vst [vmem:[#allocation2 + $0x1e0] sm:$0xff] %v421_v26  ;;  %v343_v27 = vpop.f32.mrb[29].mxu0  ;;  %v423_v28 = vpop.f32.mrb[29].mxu1 }
 0x12f   :  { %459 = vst [vmem:[#allocation2 + $0xe8] sm:$0xff] %v343_v27  ;;  %491 = vst [vmem:[#allocation2 + $0x1e8] sm:$0xff] %v423_v28  ;;  %v345_v29 = vpop.f32.mrb[30].mxu0  ;;  %v425_v30 = vpop.f32.mrb[30].mxu1 }
 0x130   :  { %460 = vst [vmem:[#allocation2 + $0xf0] sm:$0xff] %v345_v29  ;;  %492 = vst [vmem:[#allocation2 + $0x1f0] sm:$0xff] %v425_v30  ;;  %v347_v31 = vpop.f32.mrb[31].mxu0  ;;  %v427_v32 = vpop.f32.mrb[31].mxu1 }
 0x131   :  { %461 = vst [vmem:[#allocation2 + $0xf8] sm:$0xff] %v347_v31  ;;  %493 = vst [vmem:[#allocation2 + $0x1f8] sm:$0xff] %v427_v32 }
 0x132   :  { %613 = shalt.err (!%p610_p4)
}
 0x133   :  { %s614_s19 = scalar_lea.hbm %s771_s2, 8192 }
 0x134   :  { %p615_p5 = scmp.ne.s32.totalorder %s771_s2, %s614_s19  ;;  %p618_p6 = scmp.lt.u32.totalorder %s614_s19, %s771_s2 }
 0x136   :  { %p620_p7 = pnand %p618_p6, %p615_p5 }
 0x138   :  { %623 = shalt.err (!%p620_p7)
}
 0x139   :  { %s628_s24 = smov 256   ;;  %s629_s25 = smov 16  }
 0x13a   :  { %505 = dma.vmem_to_hbm [thread:$0]  %s500_s16, 8192, %s771_s2, [#allocation3], %s628_s24, %s628_s24, %s629_s25  }
 0x13b   :  { %624 = dma.done.wait [#allocation3], 8192  }
 0x13c   :  { %625 = vsyncadd [#allocation3], 4294959104 }
 0x13d   :  { %509 = vsyncpa [#allocation3], 1 }

</bundles_post_ra>
